<compile_context>
chip_gen: v5e
topology: v5e:2x2
jax: 0.10.0
libtpu: 0.0.40
codegen_flags: <defaults>
</compile_context>

<pallas_src>
import functools

import jax
import jax.numpy as jnp
from jax.experimental import pallas as pl
from jax.experimental.pallas import tpu as pltpu


# --------------------------------------------------------------------------- kernel ---

def _amvlstm_kernel(x_ref, wa_ref, ba_ref, wx_ref, bxh_ref, wh_ref, wfc_ref, bfc_ref,
                    out_ref, gx_scr, *, seq_len, chunk_batch, hidden_size, unroll):
    """One grid point == one batch chunk.

    x_ref  : (T, Bc, D)  f32   time-major input chunk
    wa/ba  : (D, D) bf16 / (1, D) f32        attention Linear
    wx     : (D, 4H) bf16                    input->gates, columns (i, f, o, g)
    bxh    : (1, 4H) f32                     fused gate bias (bx + bh), reordered
    wh     : (H, 4H) bf16                    hidden->gates, columns (i, f, o, g)
    wfc/bfc: (H, O) bf16 / (1, O) f32        final Linear
    out_ref: (Bc, O) f32
    gx_scr : (T*Bc, 4H) f32 VMEM scratch holding the precomputed x-side gate term
    """
    T, Bc, H = seq_len, chunk_batch, hidden_size
    D = x_ref.shape[-1]

    # ---- Pre-pass over ALL time steps: one big bf16 MXU batch ----
    x_all = x_ref[...].reshape(T * Bc, D)                           # (T*Bc, D) f32
    logits = (jnp.dot(x_all.astype(jnp.bfloat16), wa_ref[...],
                      preferred_element_type=jnp.float32) + ba_ref[...])
    logits = logits - jnp.max(logits, axis=-1, keepdims=True)
    e = jnp.exp(logits)
    attn = e / jnp.sum(e, axis=-1, keepdims=True)                   # exact divide (free: MXU-bound)
    xa = (x_all * attn).astype(jnp.bfloat16)                        # elementwise in f32, bf16 for MXU
    gx_scr[...] = (jnp.dot(xa, wx_ref[...], preferred_element_type=jnp.float32)
                   + bxh_ref[...])                                  # (T*Bc, 4H) f32

    # ---- Serial recurrence: only h @ Wh + elementwise per step ----
    wh = wh_ref[...]                                                # (H, 4H) bf16, hoisted

    def step(t, carry):
        h_prev, c_prev = carry
        row0 = t * Bc
        if Bc % 8 == 0:                                             # static: hint sublane alignment
            row0 = pl.multiple_of(row0, 8)
        gates = gx_scr[pl.ds(row0, Bc), :] + jnp.dot(
            h_prev.astype(jnp.bfloat16), wh, preferred_element_type=jnp.float32)
        # Gate order (i, f, o, g): one sigmoid over the contiguous 3H slab, one tanh.
        sig = jax.nn.sigmoid(gates[:, :3 * H])
        i_g = sig[:, 0 * H:1 * H]
        f_g = sig[:, 1 * H:2 * H]
        o_g = sig[:, 2 * H:3 * H]
        g_g = jnp.tanh(gates[:, 3 * H:])
        c_new = f_g * c_prev + i_g * g_g
        h_new = o_g * jnp.tanh(c_new)
        return h_new, c_new

    h0 = jnp.zeros((Bc, H), jnp.float32)
    c0 = jnp.zeros((Bc, H), jnp.float32)
    h_last, _ = jax.lax.fori_loop(0, T, step, (h0, c0), unroll=unroll)

    # ---- Final fc on the last hidden state (outs[-1].squeeze() -> Linear) ----
    out_ref[...] = (jnp.dot(h_last.astype(jnp.bfloat16), wfc_ref[...],
                            preferred_element_type=jnp.float32) + bfc_ref[...])


# -------------------------------------------------------------------------- wrapper ---

def _num_batch_chunks(batch):
    """2 batch chunks ('parallel' grid axis -> both TensorCores) on v7x, else 1."""
    try:
        kind = jax.devices()[0].device_kind.lower()
    except Exception:
        return 1
    n_tc = 2 if "v7" in kind else 1
    if n_tc > 1 and batch % (8 * n_tc) == 0:    # keep each chunk sublane-aligned
        return n_tc
    return 1


def _vmem_bytes_estimate(T, Bc, D, H, O):
    f32, bf16 = 4, 2
    G = 4 * H
    x_blk = T * Bc * D * f32 * 2                        # double-buffered input block
    weights = (D * D + D * G + H * G + H * O) * bf16 * 2
    biases = (D + G + O) * f32 * 2
    gx = T * Bc * G * f32                               # scratch
    out = Bc * O * f32 * 2
    temps = 4 * T * Bc * max(D, G) * f32                # pre-pass intermediates
    return x_blk + weights + biases + gx + out + temps


def amvlstm_forward(x, params, hidden_size, output_size):
    """x: (batch, seq, input_size) float32 -> (batch, output_size) float32."""
    B, T, D = x.shape
    H, O = hidden_size, output_size
    G = 4 * H

    wa, ba, wx, bx, wh, bh, wfc, bfc = params

    # Fuse the two gate biases and reorder gate columns (i, f, g, o) -> (i, f, o, g).
    def reorder(w):
        return jnp.concatenate(
            [w[..., 0:H], w[..., H:2 * H], w[..., 3 * H:4 * H], w[..., 2 * H:3 * H]],
            axis=-1)

    bxh = reorder(bx + bh)
    wx_r = reorder(wx).astype(jnp.bfloat16)
    wh_r = reorder(wh).astype(jnp.bfloat16)
    wa_b = wa.astype(jnp.bfloat16)
    wfc_b = wfc.astype(jnp.bfloat16)

    # Time-major 3-D layout so the batch-chunk grid axis is a plain BlockSpec slice.
    # TODO(synk): fold this transpose into the pre-pass DMA (BlockSpec over the raw
    # (B, T, D) array) to save one HBM round-trip over x at production sizes.
    x_tm = jnp.transpose(x, (1, 0, 2))                              # (T, B, D)

    num_chunks = _num_batch_chunks(B)
    Bc = B // num_chunks

    est = _vmem_bytes_estimate(T, Bc, D, H, O)
    # Explicit scoped-VMEM budget (v5e default is only 16 MiB); clamp to 64 MiB so the
    # request is also valid on v7x.  TODO(synk): if `est` approaches 64 MiB, switch to
    # the T-tiled pipelined pre-pass instead of raising the limit.
    vmem_limit = int(min(max(2 * est + (4 << 20), 32 << 20), 64 << 20))

    kernel = functools.partial(_amvlstm_kernel, seq_len=T, chunk_batch=Bc,
                               hidden_size=H, unroll=min(T, 8))

    return pl.pallas_call(
        kernel,
        out_shape=jax.ShapeDtypeStruct((B, O), jnp.float32),
        grid_spec=pltpu.PrefetchScalarGridSpec(
            num_scalar_prefetch=0,
            grid=(num_chunks,),
            in_specs=[
                pl.BlockSpec((T, Bc, D), lambda c: (0, c, 0)),      # x (f32, time-major)
                pl.BlockSpec((D, D), lambda c: (0, 0)),             # wa  bf16
                pl.BlockSpec((1, D), lambda c: (0, 0)),             # ba  f32
                pl.BlockSpec((D, G), lambda c: (0, 0)),             # wx  bf16 (reordered)
                pl.BlockSpec((1, G), lambda c: (0, 0)),             # bxh f32  (fused, reordered)
                pl.BlockSpec((H, G), lambda c: (0, 0)),             # wh  bf16 (reordered)
                pl.BlockSpec((H, O), lambda c: (0, 0)),             # wfc bf16
                pl.BlockSpec((1, O), lambda c: (0, 0)),             # bfc f32
            ],
            out_specs=pl.BlockSpec((Bc, O), lambda c: (c, 0)),
            scratch_shapes=[pltpu.VMEM((T * Bc, G), jnp.float32)],
        ),
        compiler_params=pltpu.CompilerParams(
            dimension_semantics=("parallel",),
            vmem_limit_bytes=vmem_limit,
        ),
    )(x_tm, wa_b, ba, wx_r, bxh, wh_r, wfc_b, bfc)


# ---------------------------------------------------------------- init / reference ---

def init_params(key, input_size, hidden_size, output_size):
    """Deterministic uniform(-1/sqrt(fan_in), 1/sqrt(fan_in)) init (PyTorch-like).
    Weights stored already transposed to (in, out); biases as (1, out).
    Gate column order is the PyTorch (i, f, g, o); the wrapper reorders."""
    D, H, O = input_size, hidden_size, output_size
    ks = jax.random.split(key, 8)

    def u(k, shape, fan_in):
        bound = 1.0 / jnp.sqrt(jnp.float32(fan_in))
        return jax.random.uniform(k, shape, jnp.float32, -bound, bound)

    wa = u(ks[0], (D, D), D)
    ba = u(ks[1], (1, D), D)
    wx = u(ks[2], (D, 4 * H), H)
    bx = u(ks[3], (1, 4 * H), H)
    wh = u(ks[4], (H, 4 * H), H)
    bh = u(ks[5], (1, 4 * H), H)
    wfc = u(ks[6], (H, O), H)
    bfc = u(ks[7], (1, O), H)
    return (wa, ba, wx, bx, wh, bh, wfc, bfc)


def amvlstm_reference(x, params, hidden_size):
    """Pure-JAX f32 reference mirroring the PyTorch forward (original gate order)."""
    wa, ba, wx, bx, wh, bh, wfc, bfc = params
    B, T, D = x.shape
    H = hidden_size
    h = jnp.zeros((B, H), jnp.float32)
    c = jnp.zeros((B, H), jnp.float32)
    for t in range(T):
        x_t = x[:, t, :]
        attn = jax.nn.softmax(x_t @ wa + ba, axis=-1)
        xa = x_t * attn
        gates = xa @ wx + bx + h @ wh + bh
        i_g = jax.nn.sigmoid(gates[:, 0 * H:1 * H])
        f_g = jax.nn.sigmoid(gates[:, 1 * H:2 * H])
        g_g = jnp.tanh(gates[:, 2 * H:3 * H])
        o_g = jax.nn.sigmoid(gates[:, 3 * H:4 * H])
        c = f_g * c + i_g * g_g
        h = o_g * jnp.tanh(c)
    out = jnp.squeeze(h) if 1 in h.shape else h
    return out @ wfc + bfc


# ----------------------------------------------------------------------------- main ---

if __name__ == "__main__":
    B, T, D = 8, 8, 32           # batch, seq, input_size
    H, O = 32, 1                 # hidden_size, output_size

    key = jax.random.PRNGKey(0)
    k_x, k_p = jax.random.split(key)
    x = jax.random.normal(k_x, (B, T, D), jnp.float32)
    params = init_params(k_p, D, H, O)

    out = jax.block_until_ready(amvlstm_forward(x, params, H, O))
    ref = jax.block_until_ready(amvlstm_reference(x, params, H))

    assert out.shape == (B, O), out.shape
    # Tolerance covers bf16 MXU operands (per perf review); the softmax denominator is
    # now an exact divide, so no approx-reciprocal error remains.
    assert jnp.allclose(out, ref, atol=3e-2, rtol=3e-2), (
        float(jnp.max(jnp.abs(out - ref))), out, ref)

    print("KERNEL_OK")
</pallas_src>

<mosaic_0001>
module attributes {stable_mosaic.version = 11 : i64} {
  func.func @_amvlstm_kernel(%arg0: i32, %arg1: memref<8x8x32xf32, #tpu.memory_space<vmem>>, %arg2: memref<32x32xbf16, #tpu.memory_space<vmem>>, %arg3: memref<1x32xf32, #tpu.memory_space<vmem>>, %arg4: memref<32x128xbf16, #tpu.memory_space<vmem>>, %arg5: memref<1x128xf32, #tpu.memory_space<vmem>>, %arg6: memref<32x128xbf16, #tpu.memory_space<vmem>>, %arg7: memref<32x1xbf16, #tpu.memory_space<vmem>>, %arg8: memref<1x1xf32, #tpu.memory_space<vmem>>, %arg9: memref<8x1xf32, #tpu.memory_space<vmem>>, %arg10: memref<64x128xf32, #tpu.memory_space<vmem>>) attributes {dimension_semantics = [#tpu.dimension_semantics<parallel>], iteration_bounds = array<i64: 1>, scalar_prefetch = 0 : i64, scratch_operands = 1 : i64, tpu.core_type = #tpu.core_type<tc>, window_params = [{transform_indices = @transform_0, window_bounds = array<i64: 8, 8, 32>}, {pipeline_mode = #tpu.pipeline_mode<synchronous>, transform_indices = @transform_1, window_bounds = array<i64: 32, 32>}, {pipeline_mode = #tpu.pipeline_mode<synchronous>, transform_indices = @transform_2, window_bounds = array<i64: 1, 32>}, {pipeline_mode = #tpu.pipeline_mode<synchronous>, transform_indices = @transform_3, window_bounds = array<i64: 32, 128>}, {pipeline_mode = #tpu.pipeline_mode<synchronous>, transform_indices = @transform_4, window_bounds = array<i64: 1, 128>}, {pipeline_mode = #tpu.pipeline_mode<synchronous>, transform_indices = @transform_5, window_bounds = array<i64: 32, 128>}, {pipeline_mode = #tpu.pipeline_mode<synchronous>, transform_indices = @transform_6, window_bounds = array<i64: 32, 1>}, {pipeline_mode = #tpu.pipeline_mode<synchronous>, transform_indices = @transform_7, window_bounds = array<i64: 1, 1>}, {transform_indices = @transform_8, window_bounds = array<i64: 8, 1>}]} {
    %c0 = arith.constant 0 : index
    %c0_0 = arith.constant 0 : index
    %c0_1 = arith.constant 0 : index
    %0 = vector.load %arg1[%c0, %c0_0, %c0_1] : memref<8x8x32xf32, #tpu.memory_space<vmem>>, vector<8x8x32xf32>
    %1 = vector.shape_cast %0 : vector<8x8x32xf32> to vector<64x32xf32>
    %2 = arith.truncf %1 : vector<64x32xf32> to vector<64x32xbf16>
    %c0_2 = arith.constant 0 : index
    %c0_3 = arith.constant 0 : index
    %3 = vector.load %arg2[%c0_2, %c0_3] : memref<32x32xbf16, #tpu.memory_space<vmem>>, vector<32x32xbf16>
    %cst = arith.constant dense<0.000000e+00> : vector<64x32xf32>
    %4 = tpu.matmul %2, %3, %cst {dimension_numbers = #tpu.dot_dimension_numbers<[1], [0], [0], [1], [0, 0, 1, 1], [], []>} : vector<64x32xbf16>, vector<32x32xbf16>, vector<64x32xf32> -> vector<64x32xf32>
    %c0_4 = arith.constant 0 : index
    %c0_5 = arith.constant 0 : index
    %5 = vector.load %arg3[%c0_4, %c0_5] : memref<1x32xf32, #tpu.memory_space<vmem>>, vector<1x32xf32>
    %6 = vector.broadcast %5 : vector<1x32xf32> to vector<64x32xf32>
    %7 = arith.addf %4, %6 : vector<64x32xf32>
    %cst_6 = arith.constant dense<0xFF800000> : vector<64xf32>
    %8 = vector.multi_reduction <maximumf>, %7, %cst_6 [1] : vector<64x32xf32> to vector<64xf32>
    %9 = vector.shape_cast %8 : vector<64xf32> to vector<64x1xf32>
    %10 = vector.broadcast %9 : vector<64x1xf32> to vector<64x32xf32>
    %11 = arith.subf %7, %10 : vector<64x32xf32>
    %12 = math.exp %11 : vector<64x32xf32>
    %cst_7 = arith.constant dense<0.000000e+00> : vector<64xf32>
    %13 = vector.multi_reduction <add>, %12, %cst_7 [1] : vector<64x32xf32> to vector<64xf32>
    %14 = vector.shape_cast %13 : vector<64xf32> to vector<64x1xf32>
    %15 = vector.broadcast %14 : vector<64x1xf32> to vector<64x32xf32>
    %16 = arith.divf %12, %15 : vector<64x32xf32>
    %17 = arith.mulf %1, %16 : vector<64x32xf32>
    %18 = arith.truncf %17 : vector<64x32xf32> to vector<64x32xbf16>
    %c0_8 = arith.constant 0 : index
    %c0_9 = arith.constant 0 : index
    %19 = vector.load %arg4[%c0_8, %c0_9] : memref<32x128xbf16, #tpu.memory_space<vmem>>, vector<32x128xbf16>
    %cst_10 = arith.constant dense<0.000000e+00> : vector<64x128xf32>
    %20 = tpu.matmul %18, %19, %cst_10 {dimension_numbers = #tpu.dot_dimension_numbers<[1], [0], [0], [1], [0, 0, 1, 1], [], []>} : vector<64x32xbf16>, vector<32x128xbf16>, vector<64x128xf32> -> vector<64x128xf32>
    %c0_11 = arith.constant 0 : index
    %c0_12 = arith.constant 0 : index
    %21 = vector.load %arg5[%c0_11, %c0_12] : memref<1x128xf32, #tpu.memory_space<vmem>>, vector<1x128xf32>
    %22 = vector.broadcast %21 : vector<1x128xf32> to vector<64x128xf32>
    %23 = arith.addf %20, %22 : vector<64x128xf32>
    %c0_13 = arith.constant 0 : index
    %c0_14 = arith.constant 0 : index
    %24 = vector.load %arg10[%c0_13, %c0_14] : memref<64x128xf32, #tpu.memory_space<vmem>>, vector<64x128xf32>
    tpu.vector_store %arg10[%c0_13, %c0_14], %23 {strides = array<i32>} : memref<64x128xf32, #tpu.memory_space<vmem>>, vector<64x128xf32>,
    %c0_15 = arith.constant 0 : index
    %c0_16 = arith.constant 0 : index
    %25 = vector.load %arg6[%c0_15, %c0_16] : memref<32x128xbf16, #tpu.memory_space<vmem>>, vector<32x128xbf16>
    %cst_17 = arith.constant 0.000000e+00 : f32
    %26 = vector.broadcast %cst_17 : f32 to vector<8x32xf32>
    %cst_18 = arith.constant 0.000000e+00 : f32
    %27 = vector.broadcast %cst_18 : f32 to vector<8x32xf32>
    %c0_i32 = arith.constant 0 : i32
    %c8_i32 = arith.constant 8 : i32
    %28 = arith.muli %c0_i32, %c8_i32 : i32
    %29 = tpu.assume_multiple %28, 8 : i32
    %30 = arith.index_cast %29 : i32 to index
    %c0_19 = arith.constant 0 : index
    %31 = vector.load %arg10[%30, %c0_19] : memref<64x128xf32, #tpu.memory_space<vmem>>, vector<8x128xf32>
    %32 = arith.truncf %26 : vector<8x32xf32> to vector<8x32xbf16>
    %cst_20 = arith.constant dense<0.000000e+00> : vector<8x128xf32>
    %33 = tpu.matmul %32, %25, %cst_20 {dimension_numbers = #tpu.dot_dimension_numbers<[1], [0], [0], [1], [0, 0, 1, 1], [], []>} : vector<8x32xbf16>, vector<32x128xbf16>, vector<8x128xf32> -> vector<8x128xf32>
    %34 = arith.addf %31, %33 : vector<8x128xf32>
    %35 = vector.extract_strided_slice %34 {offsets = [0, 0], sizes = [8, 96], strides = [1, 1]} : vector<8x128xf32> to vector<8x96xf32>
    %36 = arith.negf %35 : vector<8x96xf32>
    %37 = math.exp %36 : vector<8x96xf32>
    %cst_21 = arith.constant 1.000000e+00 : f32
    %38 = vector.broadcast %cst_21 : f32 to vector<8x96xf32>
    %39 = arith.addf %38, %37 : vector<8x96xf32>
    %40 = arith.divf %38, %39 : vector<8x96xf32>
    %41 = vector.extract_strided_slice %40 {offsets = [0, 0], sizes = [8, 32], strides = [1, 1]} : vector<8x96xf32> to vector<8x32xf32>
    %42 = vector.extract_strided_slice %40 {offsets = [0, 32], sizes = [8, 32], strides = [1, 1]} : vector<8x96xf32> to vector<8x32xf32>
    %43 = vector.extract_strided_slice %40 {offsets = [0, 64], sizes = [8, 32], strides = [1, 1]} : vector<8x96xf32> to vector<8x32xf32>
    %44 = vector.extract_strided_slice %34 {offsets = [0, 96], sizes = [8, 32], strides = [1, 1]} : vector<8x128xf32> to vector<8x32xf32>
    %45 = math.tanh %44 : vector<8x32xf32>
    %46 = arith.mulf %42, %27 : vector<8x32xf32>
    %47 = arith.mulf %41, %45 : vector<8x32xf32>
    %48 = arith.addf %46, %47 : vector<8x32xf32>
    %49 = math.tanh %48 : vector<8x32xf32>
    %50 = arith.mulf %43, %49 : vector<8x32xf32>
    %c1_i32 = arith.constant 1 : i32
    %c8_i32_22 = arith.constant 8 : i32
    %51 = arith.muli %c1_i32, %c8_i32_22 : i32
    %52 = tpu.assume_multiple %51, 8 : i32
    %53 = arith.index_cast %52 : i32 to index
    %c0_23 = arith.constant 0 : index
    %54 = vector.load %arg10[%53, %c0_23] : memref<64x128xf32, #tpu.memory_space<vmem>>, vector<8x128xf32>
    %55 = arith.truncf %50 : vector<8x32xf32> to vector<8x32xbf16>
    %cst_24 = arith.constant dense<0.000000e+00> : vector<8x128xf32>
    %56 = tpu.matmul %55, %25, %cst_24 {dimension_numbers = #tpu.dot_dimension_numbers<[1], [0], [0], [1], [0, 0, 1, 1], [], []>} : vector<8x32xbf16>, vector<32x128xbf16>, vector<8x128xf32> -> vector<8x128xf32>
    %57 = arith.addf %54, %56 : vector<8x128xf32>
    %58 = vector.extract_strided_slice %57 {offsets = [0, 0], sizes = [8, 96], strides = [1, 1]} : vector<8x128xf32> to vector<8x96xf32>
    %59 = arith.negf %58 : vector<8x96xf32>
    %60 = math.exp %59 : vector<8x96xf32>
    %cst_25 = arith.constant 1.000000e+00 : f32
    %61 = vector.broadcast %cst_25 : f32 to vector<8x96xf32>
    %62 = arith.addf %61, %60 : vector<8x96xf32>
    %63 = arith.divf %61, %62 : vector<8x96xf32>
    %64 = vector.extract_strided_slice %63 {offsets = [0, 0], sizes = [8, 32], strides = [1, 1]} : vector<8x96xf32> to vector<8x32xf32>
    %65 = vector.extract_strided_slice %63 {offsets = [0, 32], sizes = [8, 32], strides = [1, 1]} : vector<8x96xf32> to vector<8x32xf32>
    %66 = vector.extract_strided_slice %63 {offsets = [0, 64], sizes = [8, 32], strides = [1, 1]} : vector<8x96xf32> to vector<8x32xf32>
    %67 = vector.extract_strided_slice %57 {offsets = [0, 96], sizes = [8, 32], strides = [1, 1]} : vector<8x128xf32> to vector<8x32xf32>
    %68 = math.tanh %67 : vector<8x32xf32>
    %69 = arith.mulf %65, %48 : vector<8x32xf32>
    %70 = arith.mulf %64, %68 : vector<8x32xf32>
    %71 = arith.addf %69, %70 : vector<8x32xf32>
    %72 = math.tanh %71 : vector<8x32xf32>
    %73 = arith.mulf %66, %72 : vector<8x32xf32>
    %c2_i32 = arith.constant 2 : i32
    %c8_i32_26 = arith.constant 8 : i32
    %74 = arith.muli %c2_i32, %c8_i32_26 : i32
    %75 = tpu.assume_multiple %74, 8 : i32
    %76 = arith.index_cast %75 : i32 to index
    %c0_27 = arith.constant 0 : index
    %77 = vector.load %arg10[%76, %c0_27] : memref<64x128xf32, #tpu.memory_space<vmem>>, vector<8x128xf32>
    %78 = arith.truncf %73 : vector<8x32xf32> to vector<8x32xbf16>
    %cst_28 = arith.constant dense<0.000000e+00> : vector<8x128xf32>
    %79 = tpu.matmul %78, %25, %cst_28 {dimension_numbers = #tpu.dot_dimension_numbers<[1], [0], [0], [1], [0, 0, 1, 1], [], []>} : vector<8x32xbf16>, vector<32x128xbf16>, vector<8x128xf32> -> vector<8x128xf32>
    %80 = arith.addf %77, %79 : vector<8x128xf32>
    %81 = vector.extract_strided_slice %80 {offsets = [0, 0], sizes = [8, 96], strides = [1, 1]} : vector<8x128xf32> to vector<8x96xf32>
    %82 = arith.negf %81 : vector<8x96xf32>
    %83 = math.exp %82 : vector<8x96xf32>
    %cst_29 = arith.constant 1.000000e+00 : f32
    %84 = vector.broadcast %cst_29 : f32 to vector<8x96xf32>
    %85 = arith.addf %84, %83 : vector<8x96xf32>
    %86 = arith.divf %84, %85 : vector<8x96xf32>
    %87 = vector.extract_strided_slice %86 {offsets = [0, 0], sizes = [8, 32], strides = [1, 1]} : vector<8x96xf32> to vector<8x32xf32>
    %88 = vector.extract_strided_slice %86 {offsets = [0, 32], sizes = [8, 32], strides = [1, 1]} : vector<8x96xf32> to vector<8x32xf32>
    %89 = vector.extract_strided_slice %86 {offsets = [0, 64], sizes = [8, 32], strides = [1, 1]} : vector<8x96xf32> to vector<8x32xf32>
    %90 = vector.extract_strided_slice %80 {offsets = [0, 96], sizes = [8, 32], strides = [1, 1]} : vector<8x128xf32> to vector<8x32xf32>
    %91 = math.tanh %90 : vector<8x32xf32>
    %92 = arith.mulf %88, %71 : vector<8x32xf32>
    %93 = arith.mulf %87, %91 : vector<8x32xf32>
    %94 = arith.addf %92, %93 : vector<8x32xf32>
    %95 = math.tanh %94 : vector<8x32xf32>
    %96 = arith.mulf %89, %95 : vector<8x32xf32>
    %c3_i32 = arith.constant 3 : i32
    %c8_i32_30 = arith.constant 8 : i32
    %97 = arith.muli %c3_i32, %c8_i32_30 : i32
    %98 = tpu.assume_multiple %97, 8 : i32
    %99 = arith.index_cast %98 : i32 to index
    %c0_31 = arith.constant 0 : index
    %100 = vector.load %arg10[%99, %c0_31] : memref<64x128xf32, #tpu.memory_space<vmem>>, vector<8x128xf32>
    %101 = arith.truncf %96 : vector<8x32xf32> to vector<8x32xbf16>
    %cst_32 = arith.constant dense<0.000000e+00> : vector<8x128xf32>
    %102 = tpu.matmul %101, %25, %cst_32 {dimension_numbers = #tpu.dot_dimension_numbers<[1], [0], [0], [1], [0, 0, 1, 1], [], []>} : vector<8x32xbf16>, vector<32x128xbf16>, vector<8x128xf32> -> vector<8x128xf32>
    %103 = arith.addf %100, %102 : vector<8x128xf32>
    %104 = vector.extract_strided_slice %103 {offsets = [0, 0], sizes = [8, 96], strides = [1, 1]} : vector<8x128xf32> to vector<8x96xf32>
    %105 = arith.negf %104 : vector<8x96xf32>
    %106 = math.exp %105 : vector<8x96xf32>
    %cst_33 = arith.constant 1.000000e+00 : f32
    %107 = vector.broadcast %cst_33 : f32 to vector<8x96xf32>
    %108 = arith.addf %107, %106 : vector<8x96xf32>
    %109 = arith.divf %107, %108 : vector<8x96xf32>
    %110 = vector.extract_strided_slice %109 {offsets = [0, 0], sizes = [8, 32], strides = [1, 1]} : vector<8x96xf32> to vector<8x32xf32>
    %111 = vector.extract_strided_slice %109 {offsets = [0, 32], sizes = [8, 32], strides = [1, 1]} : vector<8x96xf32> to vector<8x32xf32>
    %112 = vector.extract_strided_slice %109 {offsets = [0, 64], sizes = [8, 32], strides = [1, 1]} : vector<8x96xf32> to vector<8x32xf32>
    %113 = vector.extract_strided_slice %103 {offsets = [0, 96], sizes = [8, 32], strides = [1, 1]} : vector<8x128xf32> to vector<8x32xf32>
    %114 = math.tanh %113 : vector<8x32xf32>
    %115 = arith.mulf %111, %94 : vector<8x32xf32>
    %116 = arith.mulf %110, %114 : vector<8x32xf32>
    %117 = arith.addf %115, %116 : vector<8x32xf32>
    %118 = math.tanh %117 : vector<8x32xf32>
    %119 = arith.mulf %112, %118 : vector<8x32xf32>
    %c4_i32 = arith.constant 4 : i32
    %c8_i32_34 = arith.constant 8 : i32
    %120 = arith.muli %c4_i32, %c8_i32_34 : i32
    %121 = tpu.assume_multiple %120, 8 : i32
    %122 = arith.index_cast %121 : i32 to index
    %c0_35 = arith.constant 0 : index
    %123 = vector.load %arg10[%122, %c0_35] : memref<64x128xf32, #tpu.memory_space<vmem>>, vector<8x128xf32>
    %124 = arith.truncf %119 : vector<8x32xf32> to vector<8x32xbf16>
    %cst_36 = arith.constant dense<0.000000e+00> : vector<8x128xf32>
    %125 = tpu.matmul %124, %25, %cst_36 {dimension_numbers = #tpu.dot_dimension_numbers<[1], [0], [0], [1], [0, 0, 1, 1], [], []>} : vector<8x32xbf16>, vector<32x128xbf16>, vector<8x128xf32> -> vector<8x128xf32>
    %126 = arith.addf %123, %125 : vector<8x128xf32>
    %127 = vector.extract_strided_slice %126 {offsets = [0, 0], sizes = [8, 96], strides = [1, 1]} : vector<8x128xf32> to vector<8x96xf32>
    %128 = arith.negf %127 : vector<8x96xf32>
    %129 = math.exp %128 : vector<8x96xf32>
    %cst_37 = arith.constant 1.000000e+00 : f32
    %130 = vector.broadcast %cst_37 : f32 to vector<8x96xf32>
    %131 = arith.addf %130, %129 : vector<8x96xf32>
    %132 = arith.divf %130, %131 : vector<8x96xf32>
    %133 = vector.extract_strided_slice %132 {offsets = [0, 0], sizes = [8, 32], strides = [1, 1]} : vector<8x96xf32> to vector<8x32xf32>
    %134 = vector.extract_strided_slice %132 {offsets = [0, 32], sizes = [8, 32], strides = [1, 1]} : vector<8x96xf32> to vector<8x32xf32>
    %135 = vector.extract_strided_slice %132 {offsets = [0, 64], sizes = [8, 32], strides = [1, 1]} : vector<8x96xf32> to vector<8x32xf32>
    %136 = vector.extract_strided_slice %126 {offsets = [0, 96], sizes = [8, 32], strides = [1, 1]} : vector<8x128xf32> to vector<8x32xf32>
    %137 = math.tanh %136 : vector<8x32xf32>
    %138 = arith.mulf %134, %117 : vector<8x32xf32>
    %139 = arith.mulf %133, %137 : vector<8x32xf32>
    %140 = arith.addf %138, %139 : vector<8x32xf32>
    %141 = math.tanh %140 : vector<8x32xf32>
    %142 = arith.mulf %135, %141 : vector<8x32xf32>
    %c5_i32 = arith.constant 5 : i32
    %c8_i32_38 = arith.constant 8 : i32
    %143 = arith.muli %c5_i32, %c8_i32_38 : i32
    %144 = tpu.assume_multiple %143, 8 : i32
    %145 = arith.index_cast %144 : i32 to index
    %c0_39 = arith.constant 0 : index
    %146 = vector.load %arg10[%145, %c0_39] : memref<64x128xf32, #tpu.memory_space<vmem>>, vector<8x128xf32>
    %147 = arith.truncf %142 : vector<8x32xf32> to vector<8x32xbf16>
    %cst_40 = arith.constant dense<0.000000e+00> : vector<8x128xf32>
    %148 = tpu.matmul %147, %25, %cst_40 {dimension_numbers = #tpu.dot_dimension_numbers<[1], [0], [0], [1], [0, 0, 1, 1], [], []>} : vector<8x32xbf16>, vector<32x128xbf16>, vector<8x128xf32> -> vector<8x128xf32>
    %149 = arith.addf %146, %148 : vector<8x128xf32>
    %150 = vector.extract_strided_slice %149 {offsets = [0, 0], sizes = [8, 96], strides = [1, 1]} : vector<8x128xf32> to vector<8x96xf32>
    %151 = arith.negf %150 : vector<8x96xf32>
    %152 = math.exp %151 : vector<8x96xf32>
    %cst_41 = arith.constant 1.000000e+00 : f32
    %153 = vector.broadcast %cst_41 : f32 to vector<8x96xf32>
    %154 = arith.addf %153, %152 : vector<8x96xf32>
    %155 = arith.divf %153, %154 : vector<8x96xf32>
    %156 = vector.extract_strided_slice %155 {offsets = [0, 0], sizes = [8, 32], strides = [1, 1]} : vector<8x96xf32> to vector<8x32xf32>
    %157 = vector.extract_strided_slice %155 {offsets = [0, 32], sizes = [8, 32], strides = [1, 1]} : vector<8x96xf32> to vector<8x32xf32>
    %158 = vector.extract_strided_slice %155 {offsets = [0, 64], sizes = [8, 32], strides = [1, 1]} : vector<8x96xf32> to vector<8x32xf32>
    %159 = vector.extract_strided_slice %149 {offsets = [0, 96], sizes = [8, 32], strides = [1, 1]} : vector<8x128xf32> to vector<8x32xf32>
    %160 = math.tanh %159 : vector<8x32xf32>
    %161 = arith.mulf %157, %140 : vector<8x32xf32>
    %162 = arith.mulf %156, %160 : vector<8x32xf32>
    %163 = arith.addf %161, %162 : vector<8x32xf32>
    %164 = math.tanh %163 : vector<8x32xf32>
    %165 = arith.mulf %158, %164 : vector<8x32xf32>
    %c6_i32 = arith.constant 6 : i32
    %c8_i32_42 = arith.constant 8 : i32
    %166 = arith.muli %c6_i32, %c8_i32_42 : i32
    %167 = tpu.assume_multiple %166, 8 : i32
    %168 = arith.index_cast %167 : i32 to index
    %c0_43 = arith.constant 0 : index
    %169 = vector.load %arg10[%168, %c0_43] : memref<64x128xf32, #tpu.memory_space<vmem>>, vector<8x128xf32>
    %170 = arith.truncf %165 : vector<8x32xf32> to vector<8x32xbf16>
    %cst_44 = arith.constant dense<0.000000e+00> : vector<8x128xf32>
    %171 = tpu.matmul %170, %25, %cst_44 {dimension_numbers = #tpu.dot_dimension_numbers<[1], [0], [0], [1], [0, 0, 1, 1], [], []>} : vector<8x32xbf16>, vector<32x128xbf16>, vector<8x128xf32> -> vector<8x128xf32>
    %172 = arith.addf %169, %171 : vector<8x128xf32>
    %173 = vector.extract_strided_slice %172 {offsets = [0, 0], sizes = [8, 96], strides = [1, 1]} : vector<8x128xf32> to vector<8x96xf32>
    %174 = arith.negf %173 : vector<8x96xf32>
    %175 = math.exp %174 : vector<8x96xf32>
    %cst_45 = arith.constant 1.000000e+00 : f32
    %176 = vector.broadcast %cst_45 : f32 to vector<8x96xf32>
    %177 = arith.addf %176, %175 : vector<8x96xf32>
    %178 = arith.divf %176, %177 : vector<8x96xf32>
    %179 = vector.extract_strided_slice %178 {offsets = [0, 0], sizes = [8, 32], strides = [1, 1]} : vector<8x96xf32> to vector<8x32xf32>
    %180 = vector.extract_strided_slice %178 {offsets = [0, 32], sizes = [8, 32], strides = [1, 1]} : vector<8x96xf32> to vector<8x32xf32>
    %181 = vector.extract_strided_slice %178 {offsets = [0, 64], sizes = [8, 32], strides = [1, 1]} : vector<8x96xf32> to vector<8x32xf32>
    %182 = vector.extract_strided_slice %172 {offsets = [0, 96], sizes = [8, 32], strides = [1, 1]} : vector<8x128xf32> to vector<8x32xf32>
    %183 = math.tanh %182 : vector<8x32xf32>
    %184 = arith.mulf %180, %163 : vector<8x32xf32>
    %185 = arith.mulf %179, %183 : vector<8x32xf32>
    %186 = arith.addf %184, %185 : vector<8x32xf32>
    %187 = math.tanh %186 : vector<8x32xf32>
    %188 = arith.mulf %181, %187 : vector<8x32xf32>
    %c7_i32 = arith.constant 7 : i32
    %c8_i32_46 = arith.constant 8 : i32
    %189 = arith.muli %c7_i32, %c8_i32_46 : i32
    %190 = tpu.assume_multiple %189, 8 : i32
    %191 = arith.index_cast %190 : i32 to index
    %c0_47 = arith.constant 0 : index
    %192 = vector.load %arg10[%191, %c0_47] : memref<64x128xf32, #tpu.memory_space<vmem>>, vector<8x128xf32>
    %193 = arith.truncf %188 : vector<8x32xf32> to vector<8x32xbf16>
    %cst_48 = arith.constant dense<0.000000e+00> : vector<8x128xf32>
    %194 = tpu.matmul %193, %25, %cst_48 {dimension_numbers = #tpu.dot_dimension_numbers<[1], [0], [0], [1], [0, 0, 1, 1], [], []>} : vector<8x32xbf16>, vector<32x128xbf16>, vector<8x128xf32> -> vector<8x128xf32>
    %195 = arith.addf %192, %194 : vector<8x128xf32>
    %196 = vector.extract_strided_slice %195 {offsets = [0, 0], sizes = [8, 96], strides = [1, 1]} : vector<8x128xf32> to vector<8x96xf32>
    %197 = arith.negf %196 : vector<8x96xf32>
    %198 = math.exp %197 : vector<8x96xf32>
    %cst_49 = arith.constant 1.000000e+00 : f32
    %199 = vector.broadcast %cst_49 : f32 to vector<8x96xf32>
    %200 = arith.addf %199, %198 : vector<8x96xf32>
    %201 = arith.divf %199, %200 : vector<8x96xf32>
    %202 = vector.extract_strided_slice %201 {offsets = [0, 0], sizes = [8, 32], strides = [1, 1]} : vector<8x96xf32> to vector<8x32xf32>
    %203 = vector.extract_strided_slice %201 {offsets = [0, 32], sizes = [8, 32], strides = [1, 1]} : vector<8x96xf32> to vector<8x32xf32>
    %204 = vector.extract_strided_slice %201 {offsets = [0, 64], sizes = [8, 32], strides = [1, 1]} : vector<8x96xf32> to vector<8x32xf32>
    %205 = vector.extract_strided_slice %195 {offsets = [0, 96], sizes = [8, 32], strides = [1, 1]} : vector<8x128xf32> to vector<8x32xf32>
    %206 = math.tanh %205 : vector<8x32xf32>
    %207 = arith.mulf %203, %186 : vector<8x32xf32>
    %208 = arith.mulf %202, %206 : vector<8x32xf32>
    %209 = arith.addf %207, %208 : vector<8x32xf32>
    %210 = math.tanh %209 : vector<8x32xf32>
    %211 = arith.mulf %204, %210 : vector<8x32xf32>
    %c8_i32_50 = arith.constant 8 : i32
    %212 = arith.truncf %211 : vector<8x32xf32> to vector<8x32xbf16>
    %c0_51 = arith.constant 0 : index
    %c0_52 = arith.constant 0 : index
    %213 = vector.load %arg7[%c0_51, %c0_52] : memref<32x1xbf16, #tpu.memory_space<vmem>>, vector<32x1xbf16>
    %cst_53 = arith.constant dense<0.000000e+00> : vector<8x1xf32>
    %214 = tpu.matmul %212, %213, %cst_53 {dimension_numbers = #tpu.dot_dimension_numbers<[1], [0], [0], [1], [0, 0, 1, 1], [], []>} : vector<8x32xbf16>, vector<32x1xbf16>, vector<8x1xf32> -> vector<8x1xf32>
    %c0_54 = arith.constant 0 : index
    %c0_55 = arith.constant 0 : index
    %215 = vector.load %arg8[%c0_54, %c0_55] : memref<1x1xf32, #tpu.memory_space<vmem>>, vector<1x1xf32>
    %216 = vector.broadcast %215 : vector<1x1xf32> to vector<8x1xf32>
    %217 = arith.addf %214, %216 : vector<8x1xf32>
    %c0_56 = arith.constant 0 : index
    %c0_57 = arith.constant 0 : index
    %218 = vector.load %arg9[%c0_56, %c0_57] : memref<8x1xf32, #tpu.memory_space<vmem>>, vector<8x1xf32>
    tpu.vector_store %arg9[%c0_56, %c0_57], %217 {strides = array<i32>} : memref<8x1xf32, #tpu.memory_space<vmem>>, vector<8x1xf32>,
    return
  }
  func.func @transform_0(%arg0: i32) -> (i32, i32, i32) {
    %c0_i32 = arith.constant 0 : i32
    %c0_i32_0 = arith.constant 0 : i32
    %c0_i32_1 = arith.constant 0 : i32
    return %c0_i32, %arg0, %c0_i32_0 : i32, i32, i32
  }
  func.func @transform_1(%arg0: i32) -> (i32, i32) {
    %c0_i32 = arith.constant 0 : i32
    %c0_i32_0 = arith.constant 0 : i32
    %c0_i32_1 = arith.constant 0 : i32
    return %c0_i32, %c0_i32_0 : i32, i32
  }
  func.func @transform_2(%arg0: i32) -> (i32, i32) {
    %c0_i32 = arith.constant 0 : i32
    %c0_i32_0 = arith.constant 0 : i32
    %c0_i32_1 = arith.constant 0 : i32
    return %c0_i32, %c0_i32_0 : i32, i32
  }
  func.func @transform_3(%arg0: i32) -> (i32, i32) {
    %c0_i32 = arith.constant 0 : i32
    %c0_i32_0 = arith.constant 0 : i32
    %c0_i32_1 = arith.constant 0 : i32
    return %c0_i32, %c0_i32_0 : i32, i32
  }
  func.func @transform_4(%arg0: i32) -> (i32, i32) {
    %c0_i32 = arith.constant 0 : i32
    %c0_i32_0 = arith.constant 0 : i32
    %c0_i32_1 = arith.constant 0 : i32
    return %c0_i32, %c0_i32_0 : i32, i32
  }
  func.func @transform_5(%arg0: i32) -> (i32, i32) {
    %c0_i32 = arith.constant 0 : i32
    %c0_i32_0 = arith.constant 0 : i32
    %c0_i32_1 = arith.constant 0 : i32
    return %c0_i32, %c0_i32_0 : i32, i32
  }
  func.func @transform_6(%arg0: i32) -> (i32, i32) {
    %c0_i32 = arith.constant 0 : i32
    %c0_i32_0 = arith.constant 0 : i32
    %c0_i32_1 = arith.constant 0 : i32
    return %c0_i32, %c0_i32_0 : i32, i32
  }
  func.func @transform_7(%arg0: i32) -> (i32, i32) {
    %c0_i32 = arith.constant 0 : i32
    %c0_i32_0 = arith.constant 0 : i32
    %c0_i32_1 = arith.constant 0 : i32
    return %c0_i32, %c0_i32_0 : i32, i32
  }
  func.func @transform_8(%arg0: i32) -> (i32, i32) {
    %c0_i32 = arith.constant 0 : i32
    %c0_i32_0 = arith.constant 0 : i32
    return %arg0, %c0_i32 : i32, i32
  }
}

</mosaic_0001>

<bundles_post_ra>
// kernel: tpu_custom_call.1
= control target key start
LH: loop header
LB: loop body
LE: loop exit
PB: predicated region body
PF: predicated region fallthrough
CT: control target
= control target key end

     0   :  { %s1456_s0 = inlined_call_operand.hbm [shape: f32[8,8,32], index: 0, kind: input, shape index: {}]   ;;  %s1457_s1 = inlined_call_operand.vmem [shape: bf16[32,32], index: 1, kind: input, shape index: {}]   ;;  %s1458_s2 = inlined_call_operand.vmem [shape: f32[1,32], index: 2, kind: input, shape index: {}]   ;;  %s1459_s3 = inlined_call_operand.hbm [shape: bf16[32,128], index: 3, kind: input, shape index: {}]   ;;  %s1460_s4 = inlined_call_operand.vmem [shape: f32[1,128], index: 4, kind: input, shape index: {}]   ;;  %s1461_s5 = inlined_call_operand.hbm [shape: bf16[32,128], index: 5, kind: input, shape index: {}]   ;;  %s1462_s6 = inlined_call_operand.vmem [shape: bf16[32,1], index: 6, kind: input, shape index: {}]   ;;  %s1463_s7 = inlined_call_operand.<no memory space> [shape: f32[1,1], index: 7, kind: input, shape index: {}]   ;;  %s1464_s8 = inlined_call_operand.vmem [shape: f32[8,1], index: 8, kind: output, shape index: {}]  }
   0x1   :  { %v13_v0 = vstv %s1463_s7 }
   0x2   :  { %14 = vst [vmem:[#allocation3] sm:$0x1] %v13_v0 }
   0x3   :  { %15 = vsyncpa [#allocation5], 0 }
   0x4   :  { %16 = vsyncpa [#allocation7], 0  ;;  %s38_s9 = sshll.u32 %s1459_s3, 4  ;;  %s1213_s10 = smov [#allocation6]   ;;  %s39_s9 = int_to_ptr.hbm [resolvable:$true] %s38_s9 }
   0x5   :  { %s40_s11 = sshll.u32 %s1213_s10, 4  ;;  %s21_s14 = sshll.u32 %s1456_s0, 4  ;;  %s41_s11 = int_to_ptr.vmem [resolvable:$true] %s40_s11  ;;  %s22_s14 = int_to_ptr.hbm [resolvable:$true] %s21_s14 }
   0x6   :  { %s1214_s15 = smov 64   ;;  %s1215_s16 = smov 4  }
   0x7   :  { %46 = dma.hbm_to_vmem [thread:$0]  %s39_s9, 256, %s41_s11, [#allocation7], %s1214_s15, %s1214_s15, %s1215_s16  }
   0x8   :  { %s1216_s7 = smov [#allocation4]   ;;  %s1217_s18 = smov 128  }
   0x9   :  { %s23_s17 = sshll.u32 %s1216_s7, 4  ;;  %s1218_s19 = smov 8   ;;  %s24_s17 = int_to_ptr.vmem [resolvable:$true] %s23_s17 }
   0xa   :  { %29 = dma.hbm_to_vmem [thread:$0]  %s22_s14, 1024, %s24_s17, [#allocation5], %s1217_s18, %s1217_s18, %s1218_s19  }
   0xb   :  { %s53_s21 = sshll.u32 %s1461_s5, 4  ;;  %s1219_s22 = smov [#allocation8]   ;;  %s54_s21 = int_to_ptr.hbm [resolvable:$true] %s53_s21 }
   0xc   :  { %s55_s23 = sshll.u32 %s1219_s22, 4  ;;  %s56_s23 = int_to_ptr.vmem [resolvable:$true] %s55_s23 }
   0xd   :  { %61 = dma.hbm_to_vmem [thread:$0]  %s54_s21, 256, %s56_s23, [#allocation7], %s1214_s15, %s1214_s15, %s1215_s16  }
   0xe   :  { %1209 = dma.done.wait [#allocation5], 1024  }
   0xf   :  { %1210 = vsyncadd [#allocation5], 4294966272 }
  0x10   :  { %1211 = dma.done.wait [#allocation7], 512  }
  0x11   :  { %1212 = vsyncadd [#allocation7], 4294966784  ;;  %v1022_v1 = vld [vmem:[%s1457_s1 + $0x8] sm:$0xff]  ;;  %v1021_v2 = vld [vmem:[%s1457_s1] sm:$0xff]  ;;  %vm111_vm0 = vcmask 261120   ;;  %v1220_v25 = vmov 0  }
  0x12   :  { %v1289_v3 = vld [vmem:[#allocation4] sm:$0xff]  ;;  %130 = vmatpush.bf16.msra.mxu0 %v1022_v1  ;;  %v1291_v4 = vld [vmem:[#allocation4 + $0x8] sm:$0xff]  ;;  %v1299_v6 = vld [vmem:[%s1458_s2] ss:$0 sm:$0xff]  ;;  %s1221_s28 = smov 32  }
  0x13   :  { %v87_v5 = vpack.c.bf16 %v1291_v4, %v1289_v3  ;;  %v1307_v23 = vld [vmem:[#allocation8 + $0x8] sm:$0xff]  ;;  %v1311_v24 = vld [vmem:[#allocation8] sm:$0xff]  ;;  %v1024_v26 = vld [vmem:[#allocation6 + $0x8] sm:$0xff] }
  0x14   :  { %452 = vmatpush.bf16.msra.mxu2 %v1307_v23  ;;  %512 = vmatpush.bf16.msra.mxu3 %v1307_v23  ;;  %v1023_v27 = vld [vmem:[#allocation6] sm:$0xff]  ;;  %v1327_v57 = vld [vmem:[%s1460_s4] ss:$0 sm:$0xff] }
  0x15   :  { %395 = vmatpush.bf16.msra.mxu1 %v1024_v26 }
  0x16   :  { %131 = vmatpush.bf16.msra.mxu0 %v1021_v2 }
  0x18   :  { %453 = vmatpush.bf16.msra.mxu2 %v1311_v24  ;;  %513 = vmatpush.bf16.msra.mxu3 %v1311_v24 }
  0x19   :  { %973 = vmatmul.msk.bf16.vlgmr.msra.gmra.mxu0 %vm111_vm0, %v87_v5  ;;  %396 = vmatpush.bf16.msra.mxu1 %v1023_v27 }
  0x1b   :  { %454 = vmatmul.bf16.vlgmr.msra.gmra.mxu2 %v1220_v25 }
  0x1c   :  { %572 = vmatpush.bf16.msrb.mxu2 %v1307_v23  ;;  %632 = vmatpush.bf16.msrb.mxu3 %v1307_v23 }
  0x20   :  { %573 = vmatpush.bf16.msrb.mxu2 %v1311_v24  ;;  %633 = vmatpush.bf16.msrb.mxu3 %v1311_v24 }
  0x24   :  { %692 = vmatpush.bf16.msra.mxu2 %v1307_v23 }
  0x28   :  { %693 = vmatpush.bf16.msra.mxu2 %v1311_v24 }
  0x96   :  { %v133_v7 = vpop.f32.mrf.mxu0 }
  0x97   :  { %v134_v8 = vadd.f32 %v1299_v6, %v133_v7 }
  0x99   :  { %v153_v9 = vsel %vm111_vm0, %v134_v8, -inf }
  0x9a   :  { %154 = vmax.xlane.f32.xlu0 %v153_v9 }
  0x9e   :  { %v135_v10 = vpop.f32.mrf.mxu0  ;;  %v455_v55 = vpop.f32.mrf.mxu2 }
  0x9f   :  { %v136_v11 = vadd.f32 %v1299_v6, %v135_v10 }
  0xa1   :  { %v156_v12 = vsel %vm111_vm0, %v136_v11, -inf }
  0xa2   :  { %157 = vmax.xlane.f32.xlu0 %v156_v12 }
  0xa6   :  { %v457_v56 = vpop.f32.mrf.mxu2 }
 0x10d   :  { %v155_v13 = vpop.xlane.xlu0 %154 }
 0x10e   :  { %v177_v14 = vsub.f32 %v134_v8, %v155_v13 }
 0x110   :  { %v185_v15 = vmul.f32 1.442695, %v177_v14 }
 0x112   :  { %1041 = vpow2.f32 %v185_v15 }
 0x115   :  { %v158_v16 = vpop.xlane.xlu0 %157 }
 0x116   :  { %v178_v17 = vsub.f32 %v136_v11, %v158_v16 }
 0x118   :  { %v1042_v18 = vpop.eup %1041  ;;  %v187_v19 = vmul.f32 1.442695, %v178_v17 }
 0x119   :  { %v201_v20 = vsel %vm111_vm0, %v1042_v18, 0.0 }
 0x11a   :  { %1043 = vpow2.f32 %v187_v19  ;;  %202 = vadd.xlane.f32.xlu1 %v201_v20 }
 0x120   :  { %v1044_v21 = vpop.eup %1043 }
 0x121   :  { %v204_v22 = vsel %vm111_vm0, %v1044_v21, 0.0 }
 0x122   :  { %205 = vadd.xlane.f32.xlu1 %v204_v22  ;;  %v1336_v22 = vld [vmem:[#allocation4 + $0x18] sm:$0xff] }
 0x18d   :  { %v203_v28 = vpop.xlane.xlu1 %202 }
 0x18e   :  { %1045 = vrcp.f32 %v203_v28  ;;  %v236_v36 = vand.u32 2147483648, %v203_v28  ;;  %vm230_vm2 = vweird.f32 %v203_v28  ;;  %v234_v37 = vand.u32 2147483647, %v203_v28 }
 0x190   :  { %v237_v41 = vor.u32 1.1754944e-38, %v236_v36  ;;  %vm235_vm4 = vcmp.eq.f32.partialorder %v234_v37, 8.507059e+37 }
 0x194   :  { %v1046_v29 = vpop.eup %1045 }
 0x195   :  { %v226_v30 = vmul.f32 %v1046_v29, %v203_v28  ;;  %v206_v31 = vpop.xlane.xlu1 %205  ;;  %vm231_vm1 = vweird.f32 %v1046_v29 }
 0x196   :  { %1047 = vrcp.f32 %v206_v31  ;;  %vm232_vm3 = vmor %vm230_vm2, %vm231_vm1  ;;  %v251_v42 = vand.u32 2147483648, %v206_v31  ;;  %v249_v44 = vand.u32 2147483647, %v206_v31  ;;  %vm245_vm6 = vweird.f32 %v206_v31 }
 0x197   :  { %v227_v32 = vsub.f32 1.0, %v226_v30 }
 0x198   :  { %v252_v47 = vor.u32 1.1754944e-38, %v251_v42  ;;  %vm250_vm8 = vcmp.eq.f32.partialorder %v249_v44, 8.507059e+37 }
 0x199   :  { %v228_v33 = vmul.f32 %v1046_v29, %v227_v32 }
 0x19b   :  { %v229_v34 = vadd.f32 %v1046_v29, %v228_v33 }
 0x19c   :  { %v1048_v35 = vpop.eup %1047 }
 0x19d   :  { %v241_v38 = vmul.f32 %v1048_v35, %v206_v31  ;;  %v233_v40 = vsel %vm232_vm3, %v1046_v29, %v229_v34  ;;  %vm246_vm5 = vweird.f32 %v1048_v35 }
 0x19e   :  { %v238_v45 = vsel %vm235_vm4, %v237_v41, %v233_v40  ;;  %vm247_vm7 = vmor %vm245_vm6, %vm246_vm5 }
 0x19f   :  { %v242_v39 = vsub.f32 1.0, %v241_v38  ;;  %v239_v48 = vmul.f32 %v1042_v18, %v238_v45 }
 0x1a1   :  { %v243_v43 = vmul.f32 %v1048_v35, %v242_v39  ;;  %v345_v52 = vmul.f32 %v239_v48, %v1289_v3 }
 0x1a3   :  { %v244_v46 = vadd.f32 %v1048_v35, %v243_v43 }
 0x1a5   :  { %v248_v49 = vsel %vm247_vm7, %v1048_v35, %v244_v46 }
 0x1a6   :  { %v253_v50 = vsel %vm250_vm8, %v252_v47, %v248_v49 }
 0x1a7   :  { %v254_v51 = vmul.f32 %v1044_v21, %v253_v50  ;;  %v1334_v21 = vld [vmem:[#allocation4 + $0x10] sm:$0xff] }
 0x1a8   :  { %v88_v25 = vpack.c.bf16 %v1336_v22, %v1334_v21 }
 0x1a9   :  { %v346_v53 = vmul.f32 %v254_v51, %v1291_v4 }
 0x1aa   :  { %974 = vmatmul.msk.bf16.gmra.mxu0 %vm111_vm0, %v88_v25 }
 0x1ab   :  { %v353_v54 = vpack.c.bf16 %v346_v53, %v345_v52 }
 0x1ad   :  { %985 = vmatmul.msk.bf16.vlgmr.msra.gmra.mxu1 %vm111_vm0, %v353_v54 }
 0x227   :  { %v138_v27 = vpop.f32.mrf.mxu0 }
 0x22a   :  { %v398_v58 = vpop.f32.mrf.mxu1 }
 0x22b   :  { %v399_v59 = vadd.f32 %v1327_v57, %v398_v58 }
 0x22d   :  { %v459_v60 = vadd.f32 %v455_v55, %v399_v59  ;;  %v139_v55 = vadd.f32 %v1299_v6, %v138_v27 }
 0x22f   :  { %1049 = vtanh.f32 %v459_v60  ;;  %v997_v62 = vmul.f32 -1.442695, %v459_v60  ;;  %v140_v28 = vpop.f32.mrf.mxu0  ;;  %v159_v56 = vsel %vm111_vm0, %v139_v55, -inf }
 0x230   :  { %v141_v29 = vadd.f32 %v1299_v6, %v140_v28 }
 0x231   :  { %1051 = vpow2.f32 %v997_v62 }
 0x232   :  { %v162_v30 = vsel %vm111_vm0, %v141_v29, -inf  ;;  %v400_v31 = vpop.f32.mrf.mxu1 }
 0x233   :  { %v401_v32 = vadd.f32 %v1327_v57, %v400_v31 }
 0x235   :  { %v1050_v61 = vpop.eup %1049 }
 0x236   :  { %482 = vrot.lane.b32.xlu2 %v1050_v61, %s1221_s28 }
 0x237   :  { %v1052_v63 = vpop.eup %1051 }
 0x238   :  { %v463_v0 = vadd.f32 1.0, %v1052_v63 }
 0x23a   :  { %1053 = vrcp.f32 %v463_v0  ;;  %v475_v7 = vand.u32 2147483648, %v463_v0  ;;  %vm469_vm10 = vweird.f32 %v463_v0  ;;  %v473_v8 = vand.u32 2147483647, %v463_v0 }
 0x23c   :  { %v476_v10 = vor.u32 1.1754944e-38, %v475_v7  ;;  %vm474_vm12 = vcmp.eq.f32.partialorder %v473_v8, 8.507059e+37 }
 0x240   :  { %v1054_v1 = vpop.eup %1053 }
 0x241   :  { %v465_v2 = vmul.f32 %v1054_v1, %v463_v0  ;;  %vm470_vm9 = vweird.f32 %v1054_v1 }
 0x242   :  { %vm471_vm11 = vmor %vm469_vm10, %vm470_vm9 }
 0x243   :  { %v466_v3 = vsub.f32 1.0, %v465_v2 }
 0x245   :  { %v467_v4 = vmul.f32 %v1054_v1, %v466_v3 }
 0x247   :  { %v468_v5 = vadd.f32 %v1054_v1, %v467_v4 }
 0x249   :  { %v472_v9 = vsel %vm471_vm11, %v1054_v1, %v468_v5 }
 0x24a   :  { %v477_v12 = vsel %vm474_vm12, %v476_v10, %v472_v9 }
 0x24b   :  { %v480_v14 = vmul.f32 0.0, %v477_v12 }
 0x290   :  { %v483_v11 = vpop.permute.xlu2 %482 }
 0x291   :  { %v485_v13 = vmul.f32 %v483_v11, %v477_v12 }
 0x293   :  { %487 = vrot.lane.b32.xlu2 %v485_v13, %s1221_s28 }
 0x2ed   :  { %v488_v15 = vpop.permute.xlu2 %487 }
 0x2ee   :  { %v490_v16 = vadd.f32 %v488_v15, %v480_v14 }
 0x2f0   :  { %1055 = vtanh.f32 %v490_v16 }
 0x2f6   :  { %v1056_v17 = vpop.eup %1055 }
 0x2f7   :  { %493 = vrot.lane.b32.xlu0 %v1056_v17, %s1221_s28 }
 0x321   :  { %163 = vmax.xlane.f32.xlu0 %v162_v30 }
 0x369   :  { %v494_v18 = vpop.permute.xlu0 %493 }
 0x36a   :  { %v496_v19 = vmul.f32 %v494_v18, %v477_v12 }
 0x36c   :  { %v499_v20 = vpack.c.bf16 %v496_v19, %v496_v19 }
 0x36e   :  { %501 = vrot.lane.b32.xlu1 %v499_v20, %s1214_s15 }
 0x394   :  { %v164_v52 = vpop.xlane.xlu0 %163 }
 0x395   :  { %v180_v53 = vsub.f32 %v141_v29, %v164_v52 }
 0x397   :  { %v191_v54 = vmul.f32 1.442695, %v180_v53 }
 0x3e0   :  { %v502_v26 = vpop.permute.xlu1 %501 }
 0x3e1   :  { %998 = vmatmul.msk.bf16.vlgmr.msra.gmra.mxu3 %vm111_vm0, %v502_v26 }
 0x3e2   :  { %752 = vmatpush.bf16.msra.mxu3 %v1307_v23 }
 0x3e6   :  { %753 = vmatpush.bf16.msra.mxu3 %v1311_v24 }
 0x464   :  { %v515_v33 = vpop.f32.mrf.mxu3 }
 0x465   :  { %v519_v34 = vadd.f32 %v515_v33, %v401_v32 }
 0x467   :  { %1057 = vtanh.f32 %v519_v34  ;;  %v999_v37 = vmul.f32 -1.442695, %v519_v34 }
 0x469   :  { %1059 = vpow2.f32 %v999_v37 }
 0x46c   :  { %v517_v35 = vpop.f32.mrf.mxu3 }
 0x46d   :  { %v1058_v36 = vpop.eup %1057 }
 0x46e   :  { %542 = vrot.lane.b32.xlu2 %v1058_v36, %s1221_s28 }
 0x46f   :  { %v1060_v38 = vpop.eup %1059 }
 0x470   :  { %v523_v39 = vadd.f32 1.0, %v1060_v38 }
 0x472   :  { %1061 = vrcp.f32 %v523_v39  ;;  %v535_v45 = vand.u32 2147483648, %v523_v39  ;;  %vm529_vm14 = vweird.f32 %v523_v39  ;;  %v533_v46 = vand.u32 2147483647, %v523_v39 }
 0x473   :  { %1063 = vpow2.f32 %v191_v54 }
 0x474   :  { %v536_v48 = vor.u32 1.1754944e-38, %v535_v45  ;;  %vm534_vm1 = vcmp.eq.f32.partialorder %v533_v46, 8.507059e+37 }
 0x478   :  { %v1062_v40 = vpop.eup %1061 }
 0x479   :  { %v525_v41 = vmul.f32 %v1062_v40, %v523_v39  ;;  %vm530_vm13 = vweird.f32 %v1062_v40  ;;  %v1064_v58 = vpop.eup %1063 }
 0x47a   :  { %vm531_vm15 = vmor %vm529_vm14, %vm530_vm13  ;;  %v210_v59 = vsel %vm111_vm0, %v1064_v58, 0.0 }
 0x47b   :  { %v526_v42 = vsub.f32 1.0, %v525_v41 }
 0x47d   :  { %v527_v43 = vmul.f32 %v1062_v40, %v526_v42 }
 0x47f   :  { %v528_v44 = vadd.f32 %v1062_v40, %v527_v43 }
 0x481   :  { %v532_v47 = vsel %vm531_vm15, %v1062_v40, %v528_v44 }
 0x482   :  { %v537_v50 = vsel %vm534_vm1, %v536_v48, %v532_v47 }
 0x483   :  { %v540_v60 = vmul.f32 %v537_v50, %v490_v16 }
 0x4c8   :  { %v543_v49 = vpop.permute.xlu2 %542 }
 0x4c9   :  { %v545_v51 = vmul.f32 %v543_v49, %v537_v50 }
 0x4cb   :  { %547 = vrot.lane.b32.xlu2 %v545_v51, %s1221_s28 }
 0x4f4   :  { %160 = vmax.xlane.f32.xlu2 %v159_v56 }
 0x4fc   :  { %211 = vadd.xlane.f32.xlu2 %v210_v59 }
 0x525   :  { %v548_v61 = vpop.permute.xlu2 %547 }
 0x526   :  { %v1352_v62 = vadd.f32 %v548_v61, %v540_v60 }
 0x528   :  { %1065 = vtanh.f32 %v1352_v62 }
 0x52e   :  { %v1066_v63 = vpop.eup %1065 }
 0x52f   :  { %553 = vrot.lane.b32.xlu1 %v1066_v63, %s1221_s28 }
 0x567   :  { %v161_v0 = vpop.xlane.xlu2 %160 }
 0x568   :  { %v179_v1 = vsub.f32 %v139_v55, %v161_v0 }
 0x56a   :  { %v189_v2 = vmul.f32 1.442695, %v179_v1 }
 0x56c   :  { %1067 = vpow2.f32 %v189_v2  ;;  %v1369_v2 = vld [vmem:[#allocation4 + $0x20] sm:$0xff] }
 0x56f   :  { %v212_v9 = vpop.xlane.xlu2 %211 }
 0x570   :  { %1069 = vrcp.f32 %v212_v9  ;;  %vm275_vm2 = vweird.f32 %v212_v9  ;;  %v281_v15 = vand.u32 2147483648, %v212_v9  ;;  %v279_v17 = vand.u32 2147483647, %v212_v9 }
 0x572   :  { %v1068_v3 = vpop.eup %1067  ;;  %v282_v20 = vor.u32 1.1754944e-38, %v281_v15  ;;  %vm280_vm5 = vcmp.eq.f32.partialorder %v279_v17, 8.507059e+37 }
 0x573   :  { %v207_v4 = vsel %vm111_vm0, %v1068_v3, 0.0 }
 0x574   :  { %208 = vadd.xlane.f32.xlu1 %v207_v4 }
 0x576   :  { %v1070_v10 = vpop.eup %1069 }
 0x577   :  { %v271_v11 = vmul.f32 %v1070_v10, %v212_v9  ;;  %vm276_vm3 = vweird.f32 %v1070_v10 }
 0x578   :  { %vm277_vm4 = vmor %vm275_vm2, %vm276_vm3 }
 0x579   :  { %v272_v12 = vsub.f32 1.0, %v271_v11 }
 0x57b   :  { %v273_v14 = vmul.f32 %v1070_v10, %v272_v12 }
 0x57d   :  { %v274_v16 = vadd.f32 %v1070_v10, %v273_v14 }
 0x57f   :  { %v278_v26 = vsel %vm277_vm4, %v1070_v10, %v274_v16 }
 0x580   :  { %v283_v30 = vsel %vm280_vm5, %v282_v20, %v278_v26 }
 0x581   :  { %v284_v34 = vmul.f32 %v1064_v58, %v283_v30 }
 0x583   :  { %v348_v38 = vmul.f32 %v284_v34, %v1336_v22 }
 0x5a1   :  { %v554_v5 = vpop.permute.xlu1 %553 }
 0x5a2   :  { %v556_v7 = vmul.f32 %v554_v5, %v537_v50 }
 0x5a4   :  { %v559_v8 = vpack.c.bf16 %v556_v7, %v556_v7 }
 0x5a6   :  { %561 = vrot.lane.b32.xlu0 %v559_v8, %s1214_s15 }
 0x5e7   :  { %v209_v13 = vpop.xlane.xlu1 %208 }
 0x5e8   :  { %1071 = vrcp.f32 %v209_v13  ;;  %v266_v27 = vand.u32 2147483648, %v209_v13  ;;  %v264_v29 = vand.u32 2147483647, %v209_v13  ;;  %vm260_vm7 = vweird.f32 %v209_v13 }
 0x5ea   :  { %v267_v32 = vor.u32 1.1754944e-38, %v266_v27  ;;  %vm265_vm9 = vcmp.eq.f32.partialorder %v264_v29, 8.507059e+37 }
 0x5ee   :  { %v1072_v18 = vpop.eup %1071 }
 0x5ef   :  { %v256_v19 = vmul.f32 %v1072_v18, %v209_v13  ;;  %vm261_vm6 = vweird.f32 %v1072_v18 }
 0x5f0   :  { %vm262_vm8 = vmor %vm260_vm7, %vm261_vm6 }
 0x5f1   :  { %v257_v25 = vsub.f32 1.0, %v256_v19 }
 0x5f3   :  { %v258_v28 = vmul.f32 %v1072_v18, %v257_v25 }
 0x5f5   :  { %v259_v31 = vadd.f32 %v1072_v18, %v258_v28 }
 0x5f7   :  { %v263_v33 = vsel %vm262_vm8, %v1072_v18, %v259_v31 }
 0x5f8   :  { %v268_v35 = vsel %vm265_vm9, %v267_v32, %v263_v33 }
 0x5f9   :  { %v269_v36 = vmul.f32 %v1068_v3, %v268_v35  ;;  %v1371_v3 = vld [vmem:[#allocation4 + $0x28] sm:$0xff] }
 0x5fa   :  { %v89_v4 = vpack.c.bf16 %v1371_v3, %v1369_v2 }
 0x5fb   :  { %v347_v37 = vmul.f32 %v269_v36, %v1334_v21 }
 0x5fc   :  { %975 = vmatmul.msk.bf16.gmra.mxu0 %vm111_vm0, %v89_v4 }
 0x5fd   :  { %v354_v39 = vpack.c.bf16 %v348_v38, %v347_v37 }
 0x5ff   :  { %986 = vmatmul.msk.bf16.gmra.mxu1 %vm111_vm0, %v354_v39 }
 0x618   :  { %v562_v40 = vpop.permute.xlu0 %561 }
 0x619   :  { %1000 = vmatmul.msk.bf16.vlgmr.msrb.gmra.mxu2 %vm111_vm0, %v562_v40 }
 0x61a   :  { %812 = vmatpush.bf16.msrb.mxu2 %v1307_v23 }
 0x61e   :  { %813 = vmatpush.bf16.msrb.mxu2 %v1311_v24 }
 0x679   :  { %v143_v9 = vpop.f32.mrf.mxu0 }
 0x67c   :  { %v403_v41 = vpop.f32.mrf.mxu1 }
 0x67d   :  { %v404_v42 = vadd.f32 %v1327_v57, %v403_v41 }
 0x681   :  { %v145_v10 = vpop.f32.mrf.mxu0 }
 0x682   :  { %v146_v11 = vadd.f32 %v1299_v6, %v145_v10 }
 0x684   :  { %v168_v12 = vsel %vm111_vm0, %v146_v11, -inf  ;;  %v405_v13 = vpop.f32.mrf.mxu1 }
 0x685   :  { %v406_v14 = vadd.f32 %v1327_v57, %v405_v13 }
 0x69c   :  { %v575_v43 = vpop.f32.mrf.mxu2 }
 0x69d   :  { %v579_v44 = vadd.f32 %v575_v43, %v404_v42 }
 0x69f   :  { %1073 = vtanh.f32 %v579_v44  ;;  %v1001_v22 = vmul.f32 -1.442695, %v579_v44 }
 0x6a1   :  { %1075 = vpow2.f32 %v1001_v22 }
 0x6a4   :  { %v577_v45 = vpop.f32.mrf.mxu2 }
 0x6a5   :  { %v1074_v21 = vpop.eup %1073 }
 0x6a6   :  { %602 = vrot.lane.b32.xlu2 %v1074_v21, %s1221_s28 }
 0x6a7   :  { %v1076_v46 = vpop.eup %1075 }
 0x6a8   :  { %v583_v47 = vadd.f32 1.0, %v1076_v46 }
 0x6aa   :  { %1077 = vrcp.f32 %v583_v47  ;;  %v595_v53 = vand.u32 2147483648, %v583_v47  ;;  %vm589_vm11 = vweird.f32 %v583_v47  ;;  %v593_v54 = vand.u32 2147483647, %v583_v47 }
 0x6ac   :  { %v596_v56 = vor.u32 1.1754944e-38, %v595_v53  ;;  %vm594_vm13 = vcmp.eq.f32.partialorder %v593_v54, 8.507059e+37 }
 0x6b0   :  { %v1078_v48 = vpop.eup %1077 }
 0x6b1   :  { %v585_v49 = vmul.f32 %v1078_v48, %v583_v47  ;;  %vm590_vm10 = vweird.f32 %v1078_v48 }
 0x6b2   :  { %vm591_vm12 = vmor %vm589_vm11, %vm590_vm10 }
 0x6b3   :  { %v586_v50 = vsub.f32 1.0, %v585_v49 }
 0x6b5   :  { %v587_v51 = vmul.f32 %v1078_v48, %v586_v50 }
 0x6b7   :  { %v588_v52 = vadd.f32 %v1078_v48, %v587_v51 }
 0x6b9   :  { %v592_v55 = vsel %vm591_vm12, %v1078_v48, %v588_v52 }
 0x6ba   :  { %v597_v59 = vsel %vm594_vm13, %v596_v56, %v592_v55 }
 0x6bb   :  { %v600_v61 = vmul.f32 %v597_v59, %v1352_v62 }
 0x700   :  { %v603_v58 = vpop.permute.xlu2 %602 }
 0x701   :  { %v605_v60 = vmul.f32 %v603_v58, %v597_v59 }
 0x703   :  { %607 = vrot.lane.b32.xlu1 %v605_v60, %s1221_s28 }
 0x72d   :  { %169 = vmax.xlane.f32.xlu1 %v168_v12 }
 0x775   :  { %v608_v63 = vpop.permute.xlu1 %607 }
 0x776   :  { %v610_v0 = vadd.f32 %v608_v63, %v600_v61 }
 0x778   :  { %1079 = vtanh.f32 %v610_v0 }
 0x77e   :  { %v1080_v1 = vpop.eup %1079 }
 0x77f   :  { %613 = vrot.lane.b32.xlu0 %v1080_v1, %s1221_s28 }
 0x7f1   :  { %v614_v5 = vpop.permute.xlu0 %613 }
 0x7f2   :  { %v616_v7 = vmul.f32 %v614_v5, %v597_v59 }
 0x7f4   :  { %v619_v8 = vpack.c.bf16 %v616_v7, %v616_v7 }
 0x7f6   :  { %621 = vrot.lane.b32.xlu2 %v619_v8, %s1214_s15 }
 0x850   :  { %v622_v62 = vpop.permute.xlu2 %621 }
 0x851   :  { %1002 = vmatmul.msk.bf16.vlgmr.msrb.gmra.mxu3 %vm111_vm0, %v622_v62 }
 0x852   :  { %872 = vmatpush.bf16.msrb.mxu3 %v1307_v23  ;;  %v170_v23 = vpop.xlane.xlu1 %169 }
 0x853   :  { %v182_v19 = vsub.f32 %v146_v11, %v170_v23 }
 0x855   :  { %v195_v20 = vmul.f32 1.442695, %v182_v19 }
 0x856   :  { %873 = vmatpush.bf16.msrb.mxu3 %v1311_v24  ;;  %v144_v24 = vadd.f32 %v1299_v6, %v143_v9 }
 0x858   :  { %v165_v25 = vsel %vm111_vm0, %v144_v24, -inf }
 0x8d4   :  { %v635_v15 = vpop.f32.mrf.mxu3 }
 0x8d5   :  { %v639_v16 = vadd.f32 %v635_v15, %v406_v14 }
 0x8d7   :  { %1081 = vtanh.f32 %v639_v16  ;;  %v1003_v28 = vmul.f32 -1.442695, %v639_v16 }
 0x8d8   :  { %1083 = vpow2.f32 %v195_v20 }
 0x8d9   :  { %1085 = vpow2.f32 %v1003_v28 }
 0x8dc   :  { %v637_v17 = vpop.f32.mrf.mxu3 }
 0x8dd   :  { %v1082_v18 = vpop.eup %1081 }
 0x8de   :  { %662 = vrot.lane.b32.xlu0 %v1082_v18, %s1221_s28  ;;  %v1386_v26 = vpop.eup %1083 }
 0x8df   :  { %v216_v27 = vsel %vm111_vm0, %v1386_v26, 0.0  ;;  %v1086_v29 = vpop.eup %1085 }
 0x8e0   :  { %v643_v30 = vadd.f32 1.0, %v1086_v29 }
 0x8e2   :  { %1087 = vrcp.f32 %v643_v30  ;;  %v655_v36 = vand.u32 2147483648, %v643_v30  ;;  %vm649_vm15 = vweird.f32 %v643_v30  ;;  %v653_v37 = vand.u32 2147483647, %v643_v30 }
 0x8e4   :  { %v656_v39 = vor.u32 1.1754944e-38, %v655_v36  ;;  %vm654_vm2 = vcmp.eq.f32.partialorder %v653_v37, 8.507059e+37 }
 0x8e8   :  { %v1088_v31 = vpop.eup %1087 }
 0x8e9   :  { %v645_v32 = vmul.f32 %v1088_v31, %v643_v30  ;;  %vm650_vm14 = vweird.f32 %v1088_v31 }
 0x8ea   :  { %vm651_vm1 = vmor %vm649_vm15, %vm650_vm14 }
 0x8eb   :  { %v646_v33 = vsub.f32 1.0, %v645_v32 }
 0x8ed   :  { %v647_v34 = vmul.f32 %v1088_v31, %v646_v33 }
 0x8ef   :  { %v648_v35 = vadd.f32 %v1088_v31, %v647_v34 }
 0x8f1   :  { %v652_v38 = vsel %vm651_vm1, %v1088_v31, %v648_v35 }
 0x8f2   :  { %v657_v41 = vsel %vm654_vm2, %v656_v39, %v652_v38 }
 0x8f3   :  { %v660_v43 = vmul.f32 %v657_v41, %v610_v0 }
 0x908   :  { %166 = vmax.xlane.f32.xlu0 %v165_v25 }
 0x910   :  { %217 = vadd.xlane.f32.xlu0 %v216_v27 }
 0x950   :  { %v663_v40 = vpop.permute.xlu0 %662 }
 0x951   :  { %v665_v42 = vmul.f32 %v663_v40, %v657_v41 }
 0x953   :  { %667 = vrot.lane.b32.xlu2 %v665_v42, %s1221_s28 }
 0x97b   :  { %v167_v22 = vpop.xlane.xlu0 %166 }
 0x97c   :  { %v181_v46 = vsub.f32 %v144_v24, %v167_v22 }
 0x97e   :  { %v193_v47 = vmul.f32 1.442695, %v181_v46 }
 0x983   :  { %v218_v53 = vpop.xlane.xlu0 %217 }
 0x984   :  { %vm305_vm3 = vweird.f32 %v218_v53  ;;  %v311_v60 = vand.u32 2147483648, %v218_v53  ;;  %v309_v63 = vand.u32 2147483647, %v218_v53 }
 0x986   :  { %v312_v4 = vor.u32 1.1754944e-38, %v311_v60  ;;  %vm310_vm6 = vcmp.eq.f32.partialorder %v309_v63, 8.507059e+37 }
 0x9ad   :  { %v668_v44 = vpop.permute.xlu2 %667 }
 0x9ae   :  { %v1391_v45 = vadd.f32 %v668_v44, %v660_v43 }
 0x9b0   :  { %1089 = vtanh.f32 %v1391_v45 }
 0x9b1   :  { %1091 = vpow2.f32 %v193_v47 }
 0x9b2   :  { %1093 = vrcp.f32 %v218_v53 }
 0x9b6   :  { %v1090_v21 = vpop.eup %1089 }
 0x9b7   :  { %673 = vrot.lane.b32.xlu2 %v1090_v21, %s1221_s28  ;;  %v1092_v48 = vpop.eup %1091 }
 0x9b8   :  { %v213_v49 = vsel %vm111_vm0, %v1092_v48, 0.0  ;;  %v1094_v54 = vpop.eup %1093 }
 0x9b9   :  { %v301_v55 = vmul.f32 %v1094_v54, %v218_v53  ;;  %vm306_vm4 = vweird.f32 %v1094_v54 }
 0x9ba   :  { %vm307_vm5 = vmor %vm305_vm3, %vm306_vm4 }
 0x9bb   :  { %v302_v56 = vsub.f32 1.0, %v301_v55 }
 0x9bd   :  { %v303_v59 = vmul.f32 %v1094_v54, %v302_v56 }
 0x9bf   :  { %v304_v61 = vadd.f32 %v1094_v54, %v303_v59 }
 0x9c1   :  { %v308_v7 = vsel %vm307_vm5, %v1094_v54, %v304_v61 }
 0x9c2   :  { %v313_v10 = vsel %vm310_vm6, %v312_v4, %v308_v7 }
 0x9c3   :  { %v314_v14 = vmul.f32 %v1386_v26, %v313_v10 }
 0x9c5   :  { %v350_v18 = vmul.f32 %v314_v14, %v1371_v3 }
 0x9e0   :  { %214 = vadd.xlane.f32.xlu2 %v213_v49  ;;  %v1410_v49 = vld [vmem:[#allocation4 + $0x38] sm:$0xff] }
 0xa11   :  { %v674_v50 = vpop.permute.xlu2 %673 }
 0xa12   :  { %v676_v51 = vmul.f32 %v674_v50, %v657_v41 }
 0xa14   :  { %v679_v52 = vpack.c.bf16 %v676_v51, %v676_v51 }
 0xa16   :  { %681 = vrot.lane.b32.xlu1 %v679_v52, %s1214_s15 }
 0xa53   :  { %v215_v58 = vpop.xlane.xlu2 %214 }
 0xa54   :  { %1095 = vrcp.f32 %v215_v58  ;;  %v296_v8 = vand.u32 2147483648, %v215_v58  ;;  %v294_v9 = vand.u32 2147483647, %v215_v58  ;;  %vm290_vm8 = vweird.f32 %v215_v58 }
 0xa56   :  { %v297_v12 = vor.u32 1.1754944e-38, %v296_v8  ;;  %vm295_vm10 = vcmp.eq.f32.partialorder %v294_v9, 8.507059e+37 }
 0xa5a   :  { %v1096_v0 = vpop.eup %1095 }
 0xa5b   :  { %v286_v1 = vmul.f32 %v1096_v0, %v215_v58  ;;  %vm291_vm7 = vweird.f32 %v1096_v0 }
 0xa5c   :  { %vm292_vm9 = vmor %vm290_vm8, %vm291_vm7 }
 0xa5d   :  { %v287_v5 = vsub.f32 1.0, %v286_v1 }
 0xa5f   :  { %v288_v62 = vmul.f32 %v1096_v0, %v287_v5 }
 0xa61   :  { %v289_v11 = vadd.f32 %v1096_v0, %v288_v62 }
 0xa63   :  { %v293_v13 = vsel %vm292_vm9, %v1096_v0, %v289_v11 }
 0xa64   :  { %v298_v15 = vsel %vm295_vm10, %v297_v12, %v293_v13 }
 0xa65   :  { %v299_v16 = vmul.f32 %v1092_v48, %v298_v15  ;;  %v1408_v48 = vld [vmem:[#allocation4 + $0x30] sm:$0xff] }
 0xa66   :  { %v90_v50 = vpack.c.bf16 %v1410_v49, %v1408_v48 }
 0xa67   :  { %v349_v17 = vmul.f32 %v299_v16, %v1369_v2 }
 0xa68   :  { %976 = vmatmul.msk.bf16.gmra.mxu0 %vm111_vm0, %v90_v50 }
 0xa69   :  { %v355_v23 = vpack.c.bf16 %v350_v18, %v349_v17 }
 0xa6b   :  { %987 = vmatmul.msk.bf16.gmra.mxu1 %vm111_vm0, %v355_v23 }
 0xa88   :  { %v682_v19 = vpop.permute.xlu1 %681 }
 0xa89   :  { %1004 = vmatmul.msk.bf16.vlgmr.msra.gmra.mxu2 %vm111_vm0, %v682_v19 }
 0xae5   :  { %v148_v58 = vpop.f32.mrf.mxu0 }
 0xae6   :  { %v149_v59 = vadd.f32 %v1299_v6, %v148_v58 }
 0xae8   :  { %v408_v20 = vpop.f32.mrf.mxu1  ;;  %v171_v60 = vsel %vm111_vm0, %v149_v59, -inf }
 0xae9   :  { %v409_v24 = vadd.f32 %v1327_v57, %v408_v20 }
 0xaed   :  { %v150_v61 = vpop.f32.mrf.mxu0 }
 0xaee   :  { %v151_v63 = vadd.f32 %v1299_v6, %v150_v61 }
 0xaf0   :  { %v410_v51 = vpop.f32.mrf.mxu1  ;;  %v174_v0 = vsel %vm111_vm0, %v151_v63, -inf }
 0xaf1   :  { %v411_v52 = vadd.f32 %v1327_v57, %v410_v51 }
 0xb0c   :  { %v695_v25 = vpop.f32.mrf.mxu2 }
 0xb0d   :  { %v699_v27 = vadd.f32 %v695_v25, %v409_v24 }
 0xb0f   :  { %1097 = vtanh.f32 %v699_v27  ;;  %v1005_v29 = vmul.f32 -1.442695, %v699_v27 }
 0xb11   :  { %1099 = vpow2.f32 %v1005_v29 }
 0xb14   :  { %v697_v28 = vpop.f32.mrf.mxu2 }
 0xb15   :  { %v1098_v26 = vpop.eup %1097 }
 0xb16   :  { %722 = vrot.lane.b32.xlu0 %v1098_v26, %s1221_s28 }
 0xb17   :  { %v1100_v2 = vpop.eup %1099 }
 0xb18   :  { %v703_v3 = vadd.f32 1.0, %v1100_v2 }
 0xb1a   :  { %1101 = vrcp.f32 %v703_v3  ;;  %v715_v35 = vand.u32 2147483648, %v703_v3  ;;  %vm709_vm12 = vweird.f32 %v703_v3  ;;  %v713_v36 = vand.u32 2147483647, %v703_v3 }
 0xb1c   :  { %v716_v38 = vor.u32 1.1754944e-38, %v715_v35  ;;  %vm714_vm14 = vcmp.eq.f32.partialorder %v713_v36, 8.507059e+37 }
 0xb20   :  { %v1102_v30 = vpop.eup %1101 }
 0xb21   :  { %v705_v31 = vmul.f32 %v1102_v30, %v703_v3  ;;  %vm710_vm11 = vweird.f32 %v1102_v30 }
 0xb22   :  { %vm711_vm13 = vmor %vm709_vm12, %vm710_vm11 }
 0xb23   :  { %v706_v32 = vsub.f32 1.0, %v705_v31 }
 0xb25   :  { %v707_v33 = vmul.f32 %v1102_v30, %v706_v32 }
 0xb27   :  { %v708_v34 = vadd.f32 %v1102_v30, %v707_v33 }
 0xb29   :  { %v712_v37 = vsel %vm711_vm13, %v1102_v30, %v708_v34 }
 0xb2a   :  { %v717_v40 = vsel %vm714_vm14, %v716_v38, %v712_v37 }
 0xb2b   :  { %v720_v42 = vmul.f32 %v717_v40, %v1391_v45 }
 0xb88   :  { %v723_v39 = vpop.permute.xlu0 %722 }
 0xb89   :  { %v725_v41 = vmul.f32 %v723_v39, %v717_v40 }
 0xb8b   :  { %727 = vrot.lane.b32.xlu2 %v725_v41, %s1221_s28 }
 0xbb4   :  { %172 = vmax.xlane.f32.xlu2 %v171_v60 }
 0xbe5   :  { %v728_v43 = vpop.permute.xlu2 %727 }
 0xbe6   :  { %v730_v44 = vadd.f32 %v728_v43, %v720_v42 }
 0xbe8   :  { %1103 = vtanh.f32 %v730_v44 }
 0xbee   :  { %v1104_v21 = vpop.eup %1103 }
 0xbef   :  { %733 = vrot.lane.b32.xlu1 %v1104_v21, %s1221_s28 }
 0xc27   :  { %v173_v26 = vpop.xlane.xlu2 %172 }
 0xc28   :  { %v183_v29 = vsub.f32 %v149_v59, %v173_v26 }
 0xc2a   :  { %v197_v2 = vmul.f32 1.442695, %v183_v29 }
 0xc61   :  { %v734_v22 = vpop.permute.xlu1 %733 }
 0xc62   :  { %v736_v46 = vmul.f32 %v734_v22, %v717_v40 }
 0xc64   :  { %v739_v47 = vpack.c.bf16 %v736_v46, %v736_v46 }
 0xc66   :  { %741 = vrot.lane.b32.xlu0 %v739_v47, %s1214_s15 }
 0xcd8   :  { %v742_v45 = vpop.permute.xlu0 %741 }
 0xcd9   :  { %1006 = vmatmul.msk.bf16.vlgmr.msra.gmra.mxu3 %vm111_vm0, %v742_v45 }
 0xd5c   :  { %v755_v53 = vpop.f32.mrf.mxu3 }
 0xd5d   :  { %v759_v54 = vadd.f32 %v755_v53, %v411_v52 }
 0xd5f   :  { %1105 = vtanh.f32 %v759_v54  ;;  %v1007_v1 = vmul.f32 -1.442695, %v759_v54 }
 0xd61   :  { %1107 = vpow2.f32 %v1007_v1 }
 0xd64   :  { %v757_v55 = vpop.f32.mrf.mxu3 }
 0xd65   :  { %v1106_v56 = vpop.eup %1105 }
 0xd66   :  { %782 = vrot.lane.b32.xlu1 %v1106_v56, %s1221_s28 }
 0xd67   :  { %v1108_v4 = vpop.eup %1107 }
 0xd68   :  { %v763_v5 = vadd.f32 1.0, %v1108_v4 }
 0xd6a   :  { %1109 = vrcp.f32 %v763_v5  ;;  %v775_v11 = vand.u32 2147483648, %v763_v5  ;;  %vm769_vm1 = vweird.f32 %v763_v5  ;;  %v773_v12 = vand.u32 2147483647, %v763_v5 }
 0xd6c   :  { %v776_v6 = vor.u32 1.1754944e-38, %v775_v11  ;;  %vm774_vm3 = vcmp.eq.f32.partialorder %v773_v12, 8.507059e+37 }
 0xd70   :  { %v1110_v7 = vpop.eup %1109 }
 0xd71   :  { %v765_v8 = vmul.f32 %v1110_v7, %v763_v5  ;;  %vm770_vm15 = vweird.f32 %v1110_v7 }
 0xd72   :  { %vm771_vm2 = vmor %vm769_vm1, %vm770_vm15 }
 0xd73   :  { %v766_v62 = vsub.f32 1.0, %v765_v8 }
 0xd75   :  { %v767_v9 = vmul.f32 %v1110_v7, %v766_v62 }
 0xd77   :  { %v768_v10 = vadd.f32 %v1110_v7, %v767_v9 }
 0xd79   :  { %v772_v13 = vsel %vm771_vm2, %v1110_v7, %v768_v10 }
 0xd7a   :  { %v777_v15 = vsel %vm774_vm3, %v776_v6, %v772_v13 }
 0xd7b   :  { %v780_v24 = vmul.f32 %v777_v15, %v730_v44 }
 0xd90   :  { %175 = vmax.xlane.f32.xlu1 %v174_v0 }
 0xdd8   :  { %v783_v14 = vpop.permute.xlu1 %782 }
 0xdd9   :  { %v785_v16 = vmul.f32 %v783_v14, %v777_v15 }
 0xddb   :  { %787 = vrot.lane.b32.xlu0 %v785_v16, %s1221_s28 }
 0xe03   :  { %v176_v17 = vpop.xlane.xlu1 %175 }
 0xe04   :  { %v184_v18 = vsub.f32 %v151_v63, %v176_v17 }
 0xe06   :  { %v199_v23 = vmul.f32 1.442695, %v184_v18 }
 0xe08   :  { %1111 = vpow2.f32 %v199_v23 }
 0xe0e   :  { %v1112_v19 = vpop.eup %1111 }
 0xe0f   :  { %v222_v20 = vsel %vm111_vm0, %v1112_v19, 0.0 }
 0xe10   :  { %223 = vadd.xlane.f32.xlu2 %v222_v20 }
 0xe4d   :  { %v788_v25 = vpop.permute.xlu0 %787 }
 0xe4e   :  { %v1424_v27 = vadd.f32 %v788_v25, %v780_v24 }
 0xe50   :  { %1113 = vtanh.f32 %v1424_v27 }
 0xe51   :  { %1115 = vpow2.f32 %v197_v2 }
 0xe56   :  { %v1114_v28 = vpop.eup %1113 }
 0xe57   :  { %793 = vrot.lane.b32.xlu0 %v1114_v28, %s1221_s28  ;;  %v1116_v3 = vpop.eup %1115 }
 0xe58   :  { %v219_v30 = vsel %vm111_vm0, %v1116_v3, 0.0 }
 0xe81   :  { %220 = vadd.xlane.f32.xlu0 %v219_v30 }
 0xe83   :  { %v224_v34 = vpop.xlane.xlu2 %223 }
 0xe84   :  { %1117 = vrcp.f32 %v224_v34  ;;  %vm335_vm4 = vweird.f32 %v224_v34  ;;  %v341_v40 = vand.u32 2147483648, %v224_v34  ;;  %v339_v42 = vand.u32 2147483647, %v224_v34 }
 0xe86   :  { %v342_v21 = vor.u32 1.1754944e-38, %v341_v40  ;;  %vm340_vm7 = vcmp.eq.f32.partialorder %v339_v42, 8.507059e+37 }
 0xe8a   :  { %v1118_v35 = vpop.eup %1117 }
 0xe8b   :  { %v331_v36 = vmul.f32 %v1118_v35, %v224_v34  ;;  %vm336_vm5 = vweird.f32 %v1118_v35 }
 0xe8c   :  { %vm337_vm6 = vmor %vm335_vm4, %vm336_vm5  ;;  %vm957_vm5 = vcmask 7168  }
 0xe8d   :  { %v332_v37 = vsub.f32 1.0, %v331_v36 }
 0xe8f   :  { %v333_v39 = vmul.f32 %v1118_v35, %v332_v37 }
 0xe91   :  { %v334_v41 = vadd.f32 %v1118_v35, %v333_v39 }
 0xe93   :  { %v338_v46 = vsel %vm337_vm6, %v1118_v35, %v334_v41 }
 0xe94   :  { %v343_v51 = vsel %vm340_vm7, %v342_v21, %v338_v46 }
 0xe95   :  { %v344_v55 = vmul.f32 %v1112_v19, %v343_v51 }
 0xe97   :  { %v352_v60 = vmul.f32 %v344_v55, %v1410_v49 }
 0xec9   :  { %v794_v31 = vpop.permute.xlu0 %793 }
 0xeca   :  { %v796_v32 = vmul.f32 %v794_v31, %v777_v15 }
 0xecc   :  { %v799_v33 = vpack.c.bf16 %v796_v32, %v796_v32 }
 0xece   :  { %801 = vrot.lane.b32.xlu1 %v799_v33, %s1214_s15 }
 0xef4   :  { %v221_v38 = vpop.xlane.xlu0 %220 }
 0xef5   :  { %1119 = vrcp.f32 %v221_v38  ;;  %v326_v47 = vand.u32 2147483648, %v221_v38  ;;  %v324_v45 = vand.u32 2147483647, %v221_v38  ;;  %vm320_vm9 = vweird.f32 %v221_v38 }
 0xef7   :  { %v327_v53 = vor.u32 1.1754944e-38, %v326_v47  ;;  %vm325_vm11 = vcmp.eq.f32.partialorder %v324_v45, 8.507059e+37 }
 0xefb   :  { %v1120_v43 = vpop.eup %1119 }
 0xefc   :  { %v316_v44 = vmul.f32 %v1120_v43, %v221_v38  ;;  %vm321_vm8 = vweird.f32 %v1120_v43 }
 0xefd   :  { %vm322_vm10 = vmor %vm320_vm9, %vm321_vm8 }
 0xefe   :  { %v317_v22 = vsub.f32 1.0, %v316_v44 }
 0xf00   :  { %v318_v50 = vmul.f32 %v1120_v43, %v317_v22 }
 0xf02   :  { %v319_v52 = vadd.f32 %v1120_v43, %v318_v50 }
 0xf04   :  { %v323_v54 = vsel %vm322_vm10, %v1120_v43, %v319_v52  ;;  %v1028_v52 = vld [vmem:[%s1462_s6 + $0x8] sm:$0xff] }
 0xf05   :  { %v328_v56 = vsel %vm325_vm11, %v327_v53, %v323_v54  ;;  %950 = vmatpush.bf16.msrb.mxu0 %v1028_v52  ;;  %v1027_v53 = vld [vmem:[%s1462_s6] sm:$0xff] }
 0xf06   :  { %v329_v58 = vmul.f32 %v1116_v3, %v328_v56 }
 0xf08   :  { %v351_v59 = vmul.f32 %v329_v58, %v1408_v48 }
 0xf09   :  { %951 = vmatpush.bf16.msrb.mxu0 %v1027_v53 }
 0xf0a   :  { %v356_v61 = vpack.c.bf16 %v352_v60, %v351_v59  ;;  %v1040_v59 = vld [vmem:[#allocation3] ss:$0 sm:$0xff] }
 0xf0c   :  { %988 = vmatmul.msk.bf16.gmra.mxu1 %vm111_vm0, %v356_v61 }
 0xf40   :  { %v802_v63 = vpop.permute.xlu1 %801 }
 0xf41   :  { %1008 = vmatmul.msk.bf16.vlgmr.msrb.gmra.mxu2 %vm111_vm0, %v802_v63 }
 0xf89   :  { %v413_v0 = vpop.f32.mrf.mxu1 }
 0xf8a   :  { %v414_v1 = vadd.f32 %v1327_v57, %v413_v0 }
 0xf91   :  { %v415_v3 = vpop.f32.mrf.mxu1 }
 0xf92   :  { %v416_v30 = vadd.f32 %v1327_v57, %v415_v3 }
 0xfc4   :  { %v815_v4 = vpop.f32.mrf.mxu2 }
 0xfc5   :  { %v819_v5 = vadd.f32 %v815_v4, %v414_v1 }
 0xfc7   :  { %1121 = vtanh.f32 %v819_v5  ;;  %v1009_v62 = vmul.f32 -1.442695, %v819_v5 }
 0xfc9   :  { %1123 = vpow2.f32 %v1009_v62 }
 0xfcc   :  { %v817_v7 = vpop.f32.mrf.mxu2 }
 0xfcd   :  { %v1122_v8 = vpop.eup %1121 }
 0xfce   :  { %842 = vrot.lane.b32.xlu2 %v1122_v8, %s1221_s28 }
 0xfcf   :  { %v1124_v48 = vpop.eup %1123 }
 0xfd0   :  { %v823_v49 = vadd.f32 1.0, %v1124_v48 }
 0xfd2   :  { %1125 = vrcp.f32 %v823_v49  ;;  %v835_v6 = vand.u32 2147483648, %v823_v49  ;;  %vm829_vm13 = vweird.f32 %v823_v49  ;;  %v833_v14 = vand.u32 2147483647, %v823_v49 }
 0xfd4   :  { %v836_v16 = vor.u32 1.1754944e-38, %v835_v6  ;;  %vm834_vm15 = vcmp.eq.f32.partialorder %v833_v14, 8.507059e+37 }
 0xfd8   :  { %v1126_v9 = vpop.eup %1125 }
 0xfd9   :  { %v825_v10 = vmul.f32 %v1126_v9, %v823_v49  ;;  %vm830_vm12 = vweird.f32 %v1126_v9 }
 0xfda   :  { %vm831_vm14 = vmor %vm829_vm13, %vm830_vm12 }
 0xfdb   :  { %v826_v11 = vsub.f32 1.0, %v825_v10 }
 0xfdd   :  { %v827_v12 = vmul.f32 %v1126_v9, %v826_v11 }
 0xfdf   :  { %v828_v13 = vadd.f32 %v1126_v9, %v827_v12 }
 0xfe1   :  { %v832_v15 = vsel %vm831_vm14, %v1126_v9, %v828_v13 }
 0xfe2   :  { %v837_v18 = vsel %vm834_vm15, %v836_v16, %v832_v15 }
 0xfe3   :  { %v840_v19 = vmul.f32 %v837_v18, %v1424_v27 }
0x1028   :  { %v843_v17 = vpop.permute.xlu2 %842 }
0x1029   :  { %v845_v23 = vmul.f32 %v843_v17, %v837_v18 }
0x102b   :  { %847 = vrot.lane.b32.xlu0 %v845_v23, %s1221_s28 }
0x109d   :  { %v848_v20 = vpop.permute.xlu0 %847 }
0x109e   :  { %v850_v24 = vadd.f32 %v848_v20, %v840_v19 }
0x10a0   :  { %1127 = vtanh.f32 %v850_v24 }
0x10a6   :  { %v1128_v25 = vpop.eup %1127 }
0x10a7   :  { %853 = vrot.lane.b32.xlu1 %v1128_v25, %s1221_s28 }
0x1119   :  { %v854_v28 = vpop.permute.xlu1 %853 }
0x111a   :  { %v856_v26 = vmul.f32 %v854_v28, %v837_v18 }
0x111c   :  { %v859_v29 = vpack.c.bf16 %v856_v26, %v856_v26 }
0x111e   :  { %861 = vrot.lane.b32.xlu2 %v859_v29, %s1214_s15 }
0x1178   :  { %v862_v2 = vpop.permute.xlu2 %861 }
0x1179   :  { %1010 = vmatmul.msk.bf16.vlgmr.msrb.gmra.mxu3 %vm111_vm0, %v862_v2 }
0x11fc   :  { %v875_v31 = vpop.f32.mrf.mxu3 }
0x11fd   :  { %v879_v32 = vadd.f32 %v875_v31, %v416_v30 }
0x11ff   :  { %1129 = vtanh.f32 %v879_v32  ;;  %v1011_v34 = vmul.f32 -1.442695, %v879_v32 }
0x1201   :  { %1131 = vpow2.f32 %v1011_v34 }
0x1204   :  { %v877_v27 = vpop.f32.mrf.mxu3 }
0x1205   :  { %v1130_v33 = vpop.eup %1129 }
0x1206   :  { %902 = vrot.lane.b32.xlu0 %v1130_v33, %s1221_s28 }
0x1207   :  { %v1132_v35 = vpop.eup %1131 }
0x1208   :  { %v883_v36 = vadd.f32 1.0, %v1132_v35 }
0x120a   :  { %1133 = vrcp.f32 %v883_v36  ;;  %v895_v42 = vand.u32 2147483648, %v883_v36  ;;  %vm889_vm2 = vweird.f32 %v883_v36  ;;  %v893_v57 = vand.u32 2147483647, %v883_v36 }
0x120c   :  { %v896_v44 = vor.u32 1.1754944e-38, %v895_v42  ;;  %vm894_vm4 = vcmp.eq.f32.partialorder %v893_v57, 8.507059e+37 }
0x1210   :  { %v1134_v37 = vpop.eup %1133 }
0x1211   :  { %v885_v38 = vmul.f32 %v1134_v37, %v883_v36  ;;  %vm890_vm1 = vweird.f32 %v1134_v37 }
0x1212   :  { %vm891_vm3 = vmor %vm889_vm2, %vm890_vm1 }
0x1213   :  { %v886_v39 = vsub.f32 1.0, %v885_v38 }
0x1215   :  { %v887_v40 = vmul.f32 %v1134_v37, %v886_v39 }
0x1217   :  { %v888_v41 = vadd.f32 %v1134_v37, %v887_v40 }
0x1219   :  { %v892_v43 = vsel %vm891_vm3, %v1134_v37, %v888_v41 }
0x121a   :  { %v897_v22 = vsel %vm894_vm4, %v896_v44, %v892_v43 }
0x121b   :  { %v900_v47 = vmul.f32 %v897_v22, %v850_v24 }
0x1278   :  { %v903_v21 = vpop.permute.xlu0 %902 }
0x1279   :  { %v905_v46 = vmul.f32 %v903_v21, %v897_v22 }
0x127b   :  { %907 = vrot.lane.b32.xlu1 %v905_v46, %s1221_s28 }
0x12ed   :  { %v908_v50 = vpop.permute.xlu1 %907 }
0x12ee   :  { %v910_v45 = vadd.f32 %v908_v50, %v900_v47 }
0x12f0   :  { %1135 = vtanh.f32 %v910_v45 }
0x12f6   :  { %v1136_v51 = vpop.eup %1135 }
0x12f7   :  { %913 = vrot.lane.b32.xlu2 %v1136_v51, %s1221_s28 }
0x1351   :  { %v914_v54 = vpop.permute.xlu2 %913 }
0x1352   :  { %v916_v55 = vmul.f32 %v914_v54, %v897_v22 }
0x1354   :  { %v917_v56 = vpack.c.bf16 %v916_v55, %v916_v55 }
0x1356   :  { %927 = vrot.lane.b32.xlu0 %v917_v56, %s1214_s15 }
0x13c8   :  { %v928_v58 = vpop.permute.xlu0 %927 }
0x13c9   :  { %1020 = vmatmul.msk.bf16.vlgmr.msrb.gmra.mxu0 %vm111_vm0, %v928_v58 }
0x1446   :  { %v953_v60 = vpop.f32.mrf.mxu0 }
0x1447   :  { %v954_v61 = vadd.f32 %v1040_v59, %v953_v60 }
0x1449   :  { %958 = vst.msk [vmem:[%s1464_s8] sm:$0xff] %vm957_vm5, %v954_v61 }
0x144e   :  { %v955_v63 = vpop.f32.mrf.mxu0 }
0x144f   :  { %963 = vsyncpa [#allocation5], 1 }
0x1450   :  { %964 = vsyncpa [#allocation7], 1 }

</bundles_post_ra>
